<compile_context>
chip_gen: v6e
topology: v6e:2x2x1
jax: 0.10.0
libtpu: 0.0.40
codegen_flags: <defaults>
</compile_context>

<pallas_src>
import functools

import jax
import jax.numpy as jnp
import numpy as np
from jax import lax
from jax.experimental import pallas as pl
from jax.experimental.pallas import tpu as pltpu

LANE = 128


def _round_up(x, m):
    return ((x + m - 1) // m) * m


def _cdiv(a, b):
    return -(-a // b)


def _sublane_pack(dtype):
    # sublane packing granularity (8 rows of 32-bit per vreg)
    return 8 * (4 // jnp.dtype(dtype).itemsize)


def _conv_bn_lrelu_kernel(x_ref, w_ref, shift_ref, o_ref, stage_ref, *,
                          tap_plan, cin, k_true, k_pad, tile_r, neg_slope):
    """Grid step (n, j): sample n, tile j of the flattened output grid.

    x_ref:     (1, S, Cin, L_in)   stride-deinterleaved, spatially-flattened input
    w_ref:     (cout_pad, K_pad)   BN-folded weights, K = taps*Cin (+ zero cols)
    shift_ref: (cout_pad, 1)       folded BN shift (f32)
    o_ref:     (1, cout_pad, tile_r)
    stage_ref: (K_pad, tile_r)     VMEM staging buffer = implicit-im2col RHS tile
    """
    j = pl.program_id(1)
    base = pl.multiple_of(j * tile_r, tile_r)

    # Gather the kd*kh*kw shifted slices for this tile into the staging buffer
    # so the full taps*Cin contraction runs as ONE MXU matmul.
    for t, (m, off_row, off_lane) in enumerate(tap_plan):
        start = pl.multiple_of(base + off_row * LANE, LANE)
        if off_lane == 0:
            sl = x_ref[0, m, :, pl.ds(start, tile_r)]
        else:
            # 128-aligned dynamic load, static sub-128 shift on the value.
            win = x_ref[0, m, :, pl.ds(start, tile_r + LANE)]
            sl = win[:, off_lane:off_lane + tile_r]
        stage_ref[t * cin:(t + 1) * cin, :] = sl

    if k_pad > k_true:
        # Keep the K-padding rows zero (their weight columns are zero as well,
        # but uninitialized VMEM could hold NaN; 0*NaN would poison the dot).
        stage_ref[k_true:, :] = jnp.zeros((k_pad - k_true, tile_r),
                                          stage_ref.dtype)

    y = jnp.dot(w_ref[...], stage_ref[...], preferred_element_type=jnp.float32)
    y = y + shift_ref[...]                                  # folded BatchNorm
    o_ref[0] = jnp.where(y >= 0.0, y, neg_slope * y).astype(o_ref.dtype)


def conv_layer_cbrd(x, conv_w, gamma=None, beta=None, running_mean=None,
                    running_var=None, *, stride=(1, 1, 1), padding=(0, 0, 0),
                    eps=1e-5, neg_slope=0.01, compute_dtype=None, tile_r=None):
    """ConvLayerCBRD forward, eval-mode semantics (BN running stats, Dropout=id).

    x:      (N, Cin, D, H, W)   NCDHW (PyTorch Conv3d layout)
    conv_w: (Cout, Cin, kd, kh, kw)
    Returns (N, Cout, Do, Ho, Wo) in NCDHW, dtype of x.
    compute_dtype: operand dtype for the matmul (default bfloat16; accumulation
                   and the BN/LeakyReLU epilogue are always f32).
    """
    N, Cin, D, H, W = x.shape
    Cout = conv_w.shape[0]
    kd, kh, kw = conv_w.shape[2:]
    sd, sh, sw = stride
    pd, ph, pw = padding
    Do = (D + 2 * pd - kd) // sd + 1
    Ho = (H + 2 * ph - kh) // sh + 1
    Wo = (W + 2 * pw - kw) // sw + 1
    taps = kd * kh * kw
    S = sd * sh * sw
    out_dtype = x.dtype
    cdt = jnp.bfloat16 if compute_dtype is None else compute_dtype

    # Stride-deinterleaved output grid: a contiguous slice of the flattened
    # (Do2, Ho2, Wo2) grid implements the shift for every tap, for any stride,
    # so only (a small superset of) the real output positions is computed.
    Do2 = Do + _cdiv(kd - 1, sd)
    Ho2 = Ho + _cdiv(kh - 1, sh)
    Wo2 = Wo + _cdiv(kw - 1, sw)
    plane = Ho2 * Wo2
    R2 = Do2 * plane

    cout_pad = _round_up(Cout, _sublane_pack(out_dtype))   # sublane pad only
    K_true = taps * Cin
    K_pad = _round_up(K_true, _sublane_pack(cdt))

    # Output-tile size along the flattened grid: multiple of 256 for the
    # v6e/v7x 256-wide MXU, capped so VMEM stays small on every generation.
    if tile_r is None:
        tile_r = min(1024, _round_up(R2, 256))
    assert tile_r % LANE == 0
    r_out = _round_up(R2, tile_r)
    n_tiles = r_out // tile_r

    # Tap plan: (stride-remainder slice m, 128-aligned row offset, lane offset).
    tap_plan = []
    max_off = 0
    for i in range(kd):
        for j in range(kh):
            for l in range(kw):
                m = (i % sd) * (sh * sw) + (j % sh) * sw + (l % sw)
                off = (i // sd) * plane + (j // sh) * Wo2 + (l // sw)
                tap_plan.append((m, off // LANE, off % LANE))
                max_off = max(max_off, off)
    tap_plan = tuple(tap_plan)

    # Tail so every (128-padded) tap window stays in bounds; folded into extra
    # zero depth planes so the host-side prep is a single jnp.pad.
    tail = (max_off // LANE) * LANE + LANE
    extra_planes = _cdiv(max(0, r_out + tail - R2), plane)
    Do2p = Do2 + extra_planes
    L_in = Do2p * plane

    # ---- host-side prep: one pad + one transpose, O(input) traffic only ----
    xq = x.astype(cdt)
    xq = jnp.pad(xq, ((0, 0), (0, 0),
                      (pd, Do2p * sd - pd - D),
                      (ph, Ho2 * sh - ph - H),
                      (pw, Wo2 * sw - pw - W)))
    xq = xq.reshape(N, Cin, Do2p, sd, Ho2, sh, Wo2, sw)
    xq = jnp.transpose(xq, (0, 3, 5, 7, 1, 2, 4, 6))   # no-op when stride == 1
    xf = xq.reshape(N, S, Cin, L_in)

    # Fold BatchNorm3d (eval, running stats) into weight scale + channel shift.
    if gamma is not None:
        scale = (gamma / jnp.sqrt(running_var + eps)).astype(jnp.float32)
        shift = (beta - running_mean * scale).astype(jnp.float32)
    else:
        scale = jnp.ones((Cout,), jnp.float32)
        shift = jnp.zeros((Cout,), jnp.float32)
    w2 = conv_w.astype(jnp.float32) * scale[:, None, None, None, None]
    w2 = jnp.transpose(w2, (0, 2, 3, 4, 1)).reshape(Cout, K_true)  # tap-major
    w2 = jnp.pad(w2, ((0, cout_pad - Cout), (0, K_pad - K_true))).astype(cdt)
    shift_p = jnp.pad(shift, (0, cout_pad - Cout)).reshape(cout_pad, 1)

    kernel = functools.partial(_conv_bn_lrelu_kernel, tap_plan=tap_plan,
                               cin=Cin, k_true=K_true, k_pad=K_pad,
                               tile_r=tile_r, neg_slope=float(neg_slope))

    # VMEM budget derived from actual block shapes (double-buffered inputs /
    # outputs + staging scratch), capped at the v7x 64 MiB physical VMEM.
    csz = jnp.dtype(cdt).itemsize
    osz = jnp.dtype(out_dtype).itemsize
    vmem_est = (2 * S * _round_up(Cin, _sublane_pack(cdt)) * _round_up(L_in, LANE) * csz
                + 2 * cout_pad * _round_up(K_pad, LANE) * csz
                + 2 * cout_pad * LANE * 4
                + 2 * cout_pad * tile_r * osz
                + K_pad * tile_r * csz)
    vmem_limit = int(min(64 * 1024 * 1024, max(8 * 1024 * 1024, 2 * vmem_est)))

    out_flat = pl.pallas_call(
        kernel,
        out_shape=jax.ShapeDtypeStruct((N, cout_pad, r_out), out_dtype),
        grid_spec=pltpu.PrefetchScalarGridSpec(
            num_scalar_prefetch=0,
            grid=(N, n_tiles),
            in_specs=[
                # whole (small) sample stays resident across its R tiles
                pl.BlockSpec((1, S, Cin, L_in), lambda n, j: (n, 0, 0, 0)),
                pl.BlockSpec((cout_pad, K_pad), lambda n, j: (0, 0)),
                pl.BlockSpec((cout_pad, 1), lambda n, j: (0, 0)),
            ],
            out_specs=pl.BlockSpec((1, cout_pad, tile_r),
                                   lambda n, j: (n, 0, j)),
            scratch_shapes=[pltpu.VMEM((K_pad, tile_r), cdt)],
        ),
        compiler_params=pltpu.CompilerParams(
            dimension_semantics=("parallel", "parallel"),
            vmem_limit_bytes=vmem_limit,
        ),
    )(xf, w2, shift_p)

    # Drop channel / tile padding, un-flatten, crop to the valid output grid.
    # (Positions where a tap wraps a row/depth boundary are garbage and are
    # discarded here; the intermediate must never be consumed directly.)
    out = out_flat[:, :Cout, :R2].reshape(N, Cout, Do2, Ho2, Wo2)
    out = out[:, :, :Do, :Ho, :Wo]
    # TODO(synk): train-mode BatchNorm batch statistics and Dropout RNG masking
    # are not implemented (eval-mode semantics only).
    # TODO(synk): for tiny per-sample volumes, batch several samples per grid
    # step to amortize the ~0.35us per-step overhead.
    return out


if __name__ == "__main__":
    key = jax.random.PRNGKey(0)
    kx, kwts, kg, kb, km, kv = jax.random.split(key, 6)

    N, Cin, Cout = 2, 4, 8
    D = H = W = 8
    eps = 1e-5

    x = jax.random.normal(kx, (N, Cin, D, H, W), dtype=jnp.float32)
    gamma = jax.random.uniform(kg, (Cout,), jnp.float32, 0.5, 1.5)
    beta = 0.1 * jax.random.normal(kb, (Cout,), dtype=jnp.float32)
    running_mean = 0.1 * jax.random.normal(km, (Cout,), dtype=jnp.float32)
    running_var = jax.random.uniform(kv, (Cout,), jnp.float32, 0.5, 1.5)

    def reference(x, w, stride, padding):
        y = lax.conv_general_dilated(
            x, w, window_strides=stride,
            padding=[(p, p) for p in padding],
            dimension_numbers=("NCDHW", "OIDHW", "NCDHW"),
            precision=lax.Precision.HIGHEST)
        s = gamma / jnp.sqrt(running_var + eps)
        b = beta - running_mean * s
        y = y * s[None, :, None, None, None] + b[None, :, None, None, None]
        return jnp.where(y >= 0.0, y, 0.01 * y)   # LeakyReLU(0.01); dropout=id

    configs = [
        # (kernel_size, stride, padding, tile_r override)
        ((3, 3, 3), (1, 1, 1), (1, 1, 1), None),   # dense 3x3x3, single R tile
        ((3, 3, 3), (1, 1, 1), (1, 1, 1), 256),    # same, multi-tile R axis
        ((3, 1, 1), (1, 2, 2), (1, 0, 0), None),   # asymmetric kernel + stride
    ]
    wkeys = jax.random.split(kwts, len(configs))
    for (ks, st, pad, tr), wk in zip(configs, wkeys):
        fan_in = Cin * ks[0] * ks[1] * ks[2]
        conv_w = jax.random.normal(
            wk, (Cout, Cin) + ks, dtype=jnp.float32) / np.sqrt(float(fan_in))
        y_ref = reference(x, conv_w, st, pad)

        # Exact path (f32 operands) -- tight tolerance.
        out = conv_layer_cbrd(x, conv_w, gamma, beta, running_mean, running_var,
                              stride=st, padding=pad, eps=eps,
                              compute_dtype=jnp.float32, tile_r=tr)
        out = jax.block_until_ready(out)
        assert out.shape == y_ref.shape, (out.shape, y_ref.shape)
        np.testing.assert_allclose(np.asarray(out), np.asarray(y_ref),
                                   rtol=5e-4, atol=5e-4)

        # Default fast path (bf16 operands, f32 accumulation) -- loose tolerance.
        out_bf = conv_layer_cbrd(x, conv_w, gamma, beta, running_mean,
                                 running_var, stride=st, padding=pad, eps=eps,
                                 tile_r=tr)
        out_bf = jax.block_until_ready(out_bf)
        np.testing.assert_allclose(np.asarray(out_bf), np.asarray(y_ref),
                                   rtol=5e-2, atol=5e-2)

    print("KERNEL_OK")
</pallas_src>

<mosaic_0001>
module attributes {stable_mosaic.version = 11 : i64} {
  func.func @_conv_bn_lrelu_kernel(%arg0: i32, %arg1: i32, %arg2: memref<1x1x4x1300xf32, #tpu.memory_space<vmem>>, %arg3: memref<8x112xf32, #tpu.memory_space<vmem>>, %arg4: memref<8x1xf32, #tpu.memory_space<vmem>>, %arg5: memref<1x8x1024xf32, #tpu.memory_space<vmem>>, %arg6: memref<112x1024xf32, #tpu.memory_space<vmem>>) attributes {dimension_semantics = [#tpu.dimension_semantics<parallel>, #tpu.dimension_semantics<parallel>], iteration_bounds = array<i64: 2, 1>, scalar_prefetch = 0 : i64, scratch_operands = 1 : i64, tpu.core_type = #tpu.core_type<tc>, window_params = [{transform_indices = @transform_0, window_bounds = array<i64: 1, 1, 4, 1300>}, {pipeline_mode = #tpu.pipeline_mode<synchronous>, transform_indices = @transform_1, window_bounds = array<i64: 8, 112>}, {pipeline_mode = #tpu.pipeline_mode<synchronous>, transform_indices = @transform_2, window_bounds = array<i64: 8, 1>}, {transform_indices = @transform_3, window_bounds = array<i64: 1, 8, 1024>}]} {
    %c1024_i32 = arith.constant 1024 : i32
    %0 = arith.muli %arg1, %c1024_i32 : i32
    %1 = tpu.assume_multiple %0, 1024 : i32
    %c0_i32 = arith.constant 0 : i32
    %2 = arith.addi %1, %c0_i32 : i32
    %3 = tpu.assume_multiple %2, 128 : i32
    %c0 = arith.constant 0 : index
    %c0_0 = arith.constant 0 : index
    %c0_1 = arith.constant 0 : index
    %4 = arith.index_cast %3 : i32 to index
    %5 = vector.load %arg2[%c0, %c0_0, %c0_1, %4] : memref<1x1x4x1300xf32, #tpu.memory_space<vmem>>, vector<1x1x4x1024xf32>
    %6 = vector.shape_cast %5 : vector<1x1x4x1024xf32> to vector<4x1024xf32>
    %c0_2 = arith.constant 0 : index
    %c0_3 = arith.constant 0 : index
    %7 = vector.load %arg6[%c0_2, %c0_3] : memref<112x1024xf32, #tpu.memory_space<vmem>>, vector<4x1024xf32>
    tpu.vector_store %arg6[%c0_2, %c0_3], %6 {strides = array<i32>} : memref<112x1024xf32, #tpu.memory_space<vmem>>, vector<4x1024xf32>,
    %c0_i32_4 = arith.constant 0 : i32
    %8 = arith.addi %1, %c0_i32_4 : i32
    %9 = tpu.assume_multiple %8, 128 : i32
    %c0_5 = arith.constant 0 : index
    %c0_6 = arith.constant 0 : index
    %c0_7 = arith.constant 0 : index
    %10 = arith.index_cast %9 : i32 to index
    %11 = vector.load %arg2[%c0_5, %c0_6, %c0_7, %10] : memref<1x1x4x1300xf32, #tpu.memory_space<vmem>>, vector<1x1x4x1152xf32>
    %12 = vector.shape_cast %11 : vector<1x1x4x1152xf32> to vector<4x1152xf32>
    %13 = vector.extract_strided_slice %12 {offsets = [0, 1], sizes = [4, 1024], strides = [1, 1]} : vector<4x1152xf32> to vector<4x1024xf32>
    %c4 = arith.constant 4 : index
    %c0_8 = arith.constant 0 : index
    %14 = vector.load %arg6[%c4, %c0_8] : memref<112x1024xf32, #tpu.memory_space<vmem>>, vector<4x1024xf32>
    tpu.vector_store %arg6[%c4, %c0_8], %13 {strides = array<i32>} : memref<112x1024xf32, #tpu.memory_space<vmem>>, vector<4x1024xf32>,
    %c0_i32_9 = arith.constant 0 : i32
    %15 = arith.addi %1, %c0_i32_9 : i32
    %16 = tpu.assume_multiple %15, 128 : i32
    %c0_10 = arith.constant 0 : index
    %c0_11 = arith.constant 0 : index
    %c0_12 = arith.constant 0 : index
    %17 = arith.index_cast %16 : i32 to index
    %18 = vector.load %arg2[%c0_10, %c0_11, %c0_12, %17] : memref<1x1x4x1300xf32, #tpu.memory_space<vmem>>, vector<1x1x4x1152xf32>
    %19 = vector.shape_cast %18 : vector<1x1x4x1152xf32> to vector<4x1152xf32>
    %20 = vector.extract_strided_slice %19 {offsets = [0, 2], sizes = [4, 1024], strides = [1, 1]} : vector<4x1152xf32> to vector<4x1024xf32>
    %c8 = arith.constant 8 : index
    %c0_13 = arith.constant 0 : index
    %21 = vector.load %arg6[%c8, %c0_13] : memref<112x1024xf32, #tpu.memory_space<vmem>>, vector<4x1024xf32>
    tpu.vector_store %arg6[%c8, %c0_13], %20 {strides = array<i32>} : memref<112x1024xf32, #tpu.memory_space<vmem>>, vector<4x1024xf32>,
    %c0_i32_14 = arith.constant 0 : i32
    %22 = arith.addi %1, %c0_i32_14 : i32
    %23 = tpu.assume_multiple %22, 128 : i32
    %c0_15 = arith.constant 0 : index
    %c0_16 = arith.constant 0 : index
    %c0_17 = arith.constant 0 : index
    %24 = arith.index_cast %23 : i32 to index
    %25 = vector.load %arg2[%c0_15, %c0_16, %c0_17, %24] : memref<1x1x4x1300xf32, #tpu.memory_space<vmem>>, vector<1x1x4x1152xf32>
    %26 = vector.shape_cast %25 : vector<1x1x4x1152xf32> to vector<4x1152xf32>
    %27 = vector.extract_strided_slice %26 {offsets = [0, 10], sizes = [4, 1024], strides = [1, 1]} : vector<4x1152xf32> to vector<4x1024xf32>
    %c12 = arith.constant 12 : index
    %c0_18 = arith.constant 0 : index
    %28 = vector.load %arg6[%c12, %c0_18] : memref<112x1024xf32, #tpu.memory_space<vmem>>, vector<4x1024xf32>
    tpu.vector_store %arg6[%c12, %c0_18], %27 {strides = array<i32>} : memref<112x1024xf32, #tpu.memory_space<vmem>>, vector<4x1024xf32>,
    %c0_i32_19 = arith.constant 0 : i32
    %29 = arith.addi %1, %c0_i32_19 : i32
    %30 = tpu.assume_multiple %29, 128 : i32
    %c0_20 = arith.constant 0 : index
    %c0_21 = arith.constant 0 : index
    %c0_22 = arith.constant 0 : index
    %31 = arith.index_cast %30 : i32 to index
    %32 = vector.load %arg2[%c0_20, %c0_21, %c0_22, %31] : memref<1x1x4x1300xf32, #tpu.memory_space<vmem>>, vector<1x1x4x1152xf32>
    %33 = vector.shape_cast %32 : vector<1x1x4x1152xf32> to vector<4x1152xf32>
    %34 = vector.extract_strided_slice %33 {offsets = [0, 11], sizes = [4, 1024], strides = [1, 1]} : vector<4x1152xf32> to vector<4x1024xf32>
    %c16 = arith.constant 16 : index
    %c0_23 = arith.constant 0 : index
    %35 = vector.load %arg6[%c16, %c0_23] : memref<112x1024xf32, #tpu.memory_space<vmem>>, vector<4x1024xf32>
    tpu.vector_store %arg6[%c16, %c0_23], %34 {strides = array<i32>} : memref<112x1024xf32, #tpu.memory_space<vmem>>, vector<4x1024xf32>,
    %c0_i32_24 = arith.constant 0 : i32
    %36 = arith.addi %1, %c0_i32_24 : i32
    %37 = tpu.assume_multiple %36, 128 : i32
    %c0_25 = arith.constant 0 : index
    %c0_26 = arith.constant 0 : index
    %c0_27 = arith.constant 0 : index
    %38 = arith.index_cast %37 : i32 to index
    %39 = vector.load %arg2[%c0_25, %c0_26, %c0_27, %38] : memref<1x1x4x1300xf32, #tpu.memory_space<vmem>>, vector<1x1x4x1152xf32>
    %40 = vector.shape_cast %39 : vector<1x1x4x1152xf32> to vector<4x1152xf32>
    %41 = vector.extract_strided_slice %40 {offsets = [0, 12], sizes = [4, 1024], strides = [1, 1]} : vector<4x1152xf32> to vector<4x1024xf32>
    %c20 = arith.constant 20 : index
    %c0_28 = arith.constant 0 : index
    %42 = vector.load %arg6[%c20, %c0_28] : memref<112x1024xf32, #tpu.memory_space<vmem>>, vector<4x1024xf32>
    tpu.vector_store %arg6[%c20, %c0_28], %41 {strides = array<i32>} : memref<112x1024xf32, #tpu.memory_space<vmem>>, vector<4x1024xf32>,
    %c0_i32_29 = arith.constant 0 : i32
    %43 = arith.addi %1, %c0_i32_29 : i32
    %44 = tpu.assume_multiple %43, 128 : i32
    %c0_30 = arith.constant 0 : index
    %c0_31 = arith.constant 0 : index
    %c0_32 = arith.constant 0 : index
    %45 = arith.index_cast %44 : i32 to index
    %46 = vector.load %arg2[%c0_30, %c0_31, %c0_32, %45] : memref<1x1x4x1300xf32, #tpu.memory_space<vmem>>, vector<1x1x4x1152xf32>
    %47 = vector.shape_cast %46 : vector<1x1x4x1152xf32> to vector<4x1152xf32>
    %48 = vector.extract_strided_slice %47 {offsets = [0, 20], sizes = [4, 1024], strides = [1, 1]} : vector<4x1152xf32> to vector<4x1024xf32>
    %c24 = arith.constant 24 : index
    %c0_33 = arith.constant 0 : index
    %49 = vector.load %arg6[%c24, %c0_33] : memref<112x1024xf32, #tpu.memory_space<vmem>>, vector<4x1024xf32>
    tpu.vector_store %arg6[%c24, %c0_33], %48 {strides = array<i32>} : memref<112x1024xf32, #tpu.memory_space<vmem>>, vector<4x1024xf32>,
    %c0_i32_34 = arith.constant 0 : i32
    %50 = arith.addi %1, %c0_i32_34 : i32
    %51 = tpu.assume_multiple %50, 128 : i32
    %c0_35 = arith.constant 0 : index
    %c0_36 = arith.constant 0 : index
    %c0_37 = arith.constant 0 : index
    %52 = arith.index_cast %51 : i32 to index
    %53 = vector.load %arg2[%c0_35, %c0_36, %c0_37, %52] : memref<1x1x4x1300xf32, #tpu.memory_space<vmem>>, vector<1x1x4x1152xf32>
    %54 = vector.shape_cast %53 : vector<1x1x4x1152xf32> to vector<4x1152xf32>
    %55 = vector.extract_strided_slice %54 {offsets = [0, 21], sizes = [4, 1024], strides = [1, 1]} : vector<4x1152xf32> to vector<4x1024xf32>
    %c28 = arith.constant 28 : index
    %c0_38 = arith.constant 0 : index
    %56 = vector.load %arg6[%c28, %c0_38] : memref<112x1024xf32, #tpu.memory_space<vmem>>, vector<4x1024xf32>
    tpu.vector_store %arg6[%c28, %c0_38], %55 {strides = array<i32>} : memref<112x1024xf32, #tpu.memory_space<vmem>>, vector<4x1024xf32>,
    %c0_i32_39 = arith.constant 0 : i32
    %57 = arith.addi %1, %c0_i32_39 : i32
    %58 = tpu.assume_multiple %57, 128 : i32
    %c0_40 = arith.constant 0 : index
    %c0_41 = arith.constant 0 : index
    %c0_42 = arith.constant 0 : index
    %59 = arith.index_cast %58 : i32 to index
    %60 = vector.load %arg2[%c0_40, %c0_41, %c0_42, %59] : memref<1x1x4x1300xf32, #tpu.memory_space<vmem>>, vector<1x1x4x1152xf32>
    %61 = vector.shape_cast %60 : vector<1x1x4x1152xf32> to vector<4x1152xf32>
    %62 = vector.extract_strided_slice %61 {offsets = [0, 22], sizes = [4, 1024], strides = [1, 1]} : vector<4x1152xf32> to vector<4x1024xf32>
    %c32 = arith.constant 32 : index
    %c0_43 = arith.constant 0 : index
    %63 = vector.load %arg6[%c32, %c0_43] : memref<112x1024xf32, #tpu.memory_space<vmem>>, vector<4x1024xf32>
    tpu.vector_store %arg6[%c32, %c0_43], %62 {strides = array<i32>} : memref<112x1024xf32, #tpu.memory_space<vmem>>, vector<4x1024xf32>,
    %c0_i32_44 = arith.constant 0 : i32
    %64 = arith.addi %1, %c0_i32_44 : i32
    %65 = tpu.assume_multiple %64, 128 : i32
    %c0_45 = arith.constant 0 : index
    %c0_46 = arith.constant 0 : index
    %c0_47 = arith.constant 0 : index
    %66 = arith.index_cast %65 : i32 to index
    %67 = vector.load %arg2[%c0_45, %c0_46, %c0_47, %66] : memref<1x1x4x1300xf32, #tpu.memory_space<vmem>>, vector<1x1x4x1152xf32>
    %68 = vector.shape_cast %67 : vector<1x1x4x1152xf32> to vector<4x1152xf32>
    %69 = vector.extract_strided_slice %68 {offsets = [0, 100], sizes = [4, 1024], strides = [1, 1]} : vector<4x1152xf32> to vector<4x1024xf32>
    %c36 = arith.constant 36 : index
    %c0_48 = arith.constant 0 : index
    %70 = vector.load %arg6[%c36, %c0_48] : memref<112x1024xf32, #tpu.memory_space<vmem>>, vector<4x1024xf32>
    tpu.vector_store %arg6[%c36, %c0_48], %69 {strides = array<i32>} : memref<112x1024xf32, #tpu.memory_space<vmem>>, vector<4x1024xf32>,
    %c0_i32_49 = arith.constant 0 : i32
    %71 = arith.addi %1, %c0_i32_49 : i32
    %72 = tpu.assume_multiple %71, 128 : i32
    %c0_50 = arith.constant 0 : index
    %c0_51 = arith.constant 0 : index
    %c0_52 = arith.constant 0 : index
    %73 = arith.index_cast %72 : i32 to index
    %74 = vector.load %arg2[%c0_50, %c0_51, %c0_52, %73] : memref<1x1x4x1300xf32, #tpu.memory_space<vmem>>, vector<1x1x4x1152xf32>
    %75 = vector.shape_cast %74 : vector<1x1x4x1152xf32> to vector<4x1152xf32>
    %76 = vector.extract_strided_slice %75 {offsets = [0, 101], sizes = [4, 1024], strides = [1, 1]} : vector<4x1152xf32> to vector<4x1024xf32>
    %c40 = arith.constant 40 : index
    %c0_53 = arith.constant 0 : index
    %77 = vector.load %arg6[%c40, %c0_53] : memref<112x1024xf32, #tpu.memory_space<vmem>>, vector<4x1024xf32>
    tpu.vector_store %arg6[%c40, %c0_53], %76 {strides = array<i32>} : memref<112x1024xf32, #tpu.memory_space<vmem>>, vector<4x1024xf32>,
    %c0_i32_54 = arith.constant 0 : i32
    %78 = arith.addi %1, %c0_i32_54 : i32
    %79 = tpu.assume_multiple %78, 128 : i32
    %c0_55 = arith.constant 0 : index
    %c0_56 = arith.constant 0 : index
    %c0_57 = arith.constant 0 : index
    %80 = arith.index_cast %79 : i32 to index
    %81 = vector.load %arg2[%c0_55, %c0_56, %c0_57, %80] : memref<1x1x4x1300xf32, #tpu.memory_space<vmem>>, vector<1x1x4x1152xf32>
    %82 = vector.shape_cast %81 : vector<1x1x4x1152xf32> to vector<4x1152xf32>
    %83 = vector.extract_strided_slice %82 {offsets = [0, 102], sizes = [4, 1024], strides = [1, 1]} : vector<4x1152xf32> to vector<4x1024xf32>
    %c44 = arith.constant 44 : index
    %c0_58 = arith.constant 0 : index
    %84 = vector.load %arg6[%c44, %c0_58] : memref<112x1024xf32, #tpu.memory_space<vmem>>, vector<4x1024xf32>
    tpu.vector_store %arg6[%c44, %c0_58], %83 {strides = array<i32>} : memref<112x1024xf32, #tpu.memory_space<vmem>>, vector<4x1024xf32>,
    %c0_i32_59 = arith.constant 0 : i32
    %85 = arith.addi %1, %c0_i32_59 : i32
    %86 = tpu.assume_multiple %85, 128 : i32
    %c0_60 = arith.constant 0 : index
    %c0_61 = arith.constant 0 : index
    %c0_62 = arith.constant 0 : index
    %87 = arith.index_cast %86 : i32 to index
    %88 = vector.load %arg2[%c0_60, %c0_61, %c0_62, %87] : memref<1x1x4x1300xf32, #tpu.memory_space<vmem>>, vector<1x1x4x1152xf32>
    %89 = vector.shape_cast %88 : vector<1x1x4x1152xf32> to vector<4x1152xf32>
    %90 = vector.extract_strided_slice %89 {offsets = [0, 110], sizes = [4, 1024], strides = [1, 1]} : vector<4x1152xf32> to vector<4x1024xf32>
    %c48 = arith.constant 48 : index
    %c0_63 = arith.constant 0 : index
    %91 = vector.load %arg6[%c48, %c0_63] : memref<112x1024xf32, #tpu.memory_space<vmem>>, vector<4x1024xf32>
    tpu.vector_store %arg6[%c48, %c0_63], %90 {strides = array<i32>} : memref<112x1024xf32, #tpu.memory_space<vmem>>, vector<4x1024xf32>,
    %c0_i32_64 = arith.constant 0 : i32
    %92 = arith.addi %1, %c0_i32_64 : i32
    %93 = tpu.assume_multiple %92, 128 : i32
    %c0_65 = arith.constant 0 : index
    %c0_66 = arith.constant 0 : index
    %c0_67 = arith.constant 0 : index
    %94 = arith.index_cast %93 : i32 to index
    %95 = vector.load %arg2[%c0_65, %c0_66, %c0_67, %94] : memref<1x1x4x1300xf32, #tpu.memory_space<vmem>>, vector<1x1x4x1152xf32>
    %96 = vector.shape_cast %95 : vector<1x1x4x1152xf32> to vector<4x1152xf32>
    %97 = vector.extract_strided_slice %96 {offsets = [0, 111], sizes = [4, 1024], strides = [1, 1]} : vector<4x1152xf32> to vector<4x1024xf32>
    %c52 = arith.constant 52 : index
    %c0_68 = arith.constant 0 : index
    %98 = vector.load %arg6[%c52, %c0_68] : memref<112x1024xf32, #tpu.memory_space<vmem>>, vector<4x1024xf32>
    tpu.vector_store %arg6[%c52, %c0_68], %97 {strides = array<i32>} : memref<112x1024xf32, #tpu.memory_space<vmem>>, vector<4x1024xf32>,
    %c0_i32_69 = arith.constant 0 : i32
    %99 = arith.addi %1, %c0_i32_69 : i32
    %100 = tpu.assume_multiple %99, 128 : i32
    %c0_70 = arith.constant 0 : index
    %c0_71 = arith.constant 0 : index
    %c0_72 = arith.constant 0 : index
    %101 = arith.index_cast %100 : i32 to index
    %102 = vector.load %arg2[%c0_70, %c0_71, %c0_72, %101] : memref<1x1x4x1300xf32, #tpu.memory_space<vmem>>, vector<1x1x4x1152xf32>
    %103 = vector.shape_cast %102 : vector<1x1x4x1152xf32> to vector<4x1152xf32>
    %104 = vector.extract_strided_slice %103 {offsets = [0, 112], sizes = [4, 1024], strides = [1, 1]} : vector<4x1152xf32> to vector<4x1024xf32>
    %c56 = arith.constant 56 : index
    %c0_73 = arith.constant 0 : index
    %105 = vector.load %arg6[%c56, %c0_73] : memref<112x1024xf32, #tpu.memory_space<vmem>>, vector<4x1024xf32>
    tpu.vector_store %arg6[%c56, %c0_73], %104 {strides = array<i32>} : memref<112x1024xf32, #tpu.memory_space<vmem>>, vector<4x1024xf32>,
    %c0_i32_74 = arith.constant 0 : i32
    %106 = arith.addi %1, %c0_i32_74 : i32
    %107 = tpu.assume_multiple %106, 128 : i32
    %c0_75 = arith.constant 0 : index
    %c0_76 = arith.constant 0 : index
    %c0_77 = arith.constant 0 : index
    %108 = arith.index_cast %107 : i32 to index
    %109 = vector.load %arg2[%c0_75, %c0_76, %c0_77, %108] : memref<1x1x4x1300xf32, #tpu.memory_space<vmem>>, vector<1x1x4x1152xf32>
    %110 = vector.shape_cast %109 : vector<1x1x4x1152xf32> to vector<4x1152xf32>
    %111 = vector.extract_strided_slice %110 {offsets = [0, 120], sizes = [4, 1024], strides = [1, 1]} : vector<4x1152xf32> to vector<4x1024xf32>
    %c60 = arith.constant 60 : index
    %c0_78 = arith.constant 0 : index
    %112 = vector.load %arg6[%c60, %c0_78] : memref<112x1024xf32, #tpu.memory_space<vmem>>, vector<4x1024xf32>
    tpu.vector_store %arg6[%c60, %c0_78], %111 {strides = array<i32>} : memref<112x1024xf32, #tpu.memory_space<vmem>>, vector<4x1024xf32>,
    %c0_i32_79 = arith.constant 0 : i32
    %113 = arith.addi %1, %c0_i32_79 : i32
    %114 = tpu.assume_multiple %113, 128 : i32
    %c0_80 = arith.constant 0 : index
    %c0_81 = arith.constant 0 : index
    %c0_82 = arith.constant 0 : index
    %115 = arith.index_cast %114 : i32 to index
    %116 = vector.load %arg2[%c0_80, %c0_81, %c0_82, %115] : memref<1x1x4x1300xf32, #tpu.memory_space<vmem>>, vector<1x1x4x1152xf32>
    %117 = vector.shape_cast %116 : vector<1x1x4x1152xf32> to vector<4x1152xf32>
    %118 = vector.extract_strided_slice %117 {offsets = [0, 121], sizes = [4, 1024], strides = [1, 1]} : vector<4x1152xf32> to vector<4x1024xf32>
    %c64 = arith.constant 64 : index
    %c0_83 = arith.constant 0 : index
    %119 = vector.load %arg6[%c64, %c0_83] : memref<112x1024xf32, #tpu.memory_space<vmem>>, vector<4x1024xf32>
    tpu.vector_store %arg6[%c64, %c0_83], %118 {strides = array<i32>} : memref<112x1024xf32, #tpu.memory_space<vmem>>, vector<4x1024xf32>,
    %c0_i32_84 = arith.constant 0 : i32
    %120 = arith.addi %1, %c0_i32_84 : i32
    %121 = tpu.assume_multiple %120, 128 : i32
    %c0_85 = arith.constant 0 : index
    %c0_86 = arith.constant 0 : index
    %c0_87 = arith.constant 0 : index
    %122 = arith.index_cast %121 : i32 to index
    %123 = vector.load %arg2[%c0_85, %c0_86, %c0_87, %122] : memref<1x1x4x1300xf32, #tpu.memory_space<vmem>>, vector<1x1x4x1152xf32>
    %124 = vector.shape_cast %123 : vector<1x1x4x1152xf32> to vector<4x1152xf32>
    %125 = vector.extract_strided_slice %124 {offsets = [0, 122], sizes = [4, 1024], strides = [1, 1]} : vector<4x1152xf32> to vector<4x1024xf32>
    %c68 = arith.constant 68 : index
    %c0_88 = arith.constant 0 : index
    %126 = vector.load %arg6[%c68, %c0_88] : memref<112x1024xf32, #tpu.memory_space<vmem>>, vector<4x1024xf32>
    tpu.vector_store %arg6[%c68, %c0_88], %125 {strides = array<i32>} : memref<112x1024xf32, #tpu.memory_space<vmem>>, vector<4x1024xf32>,
    %c128_i32 = arith.constant 128 : i32
    %127 = arith.addi %1, %c128_i32 : i32
    %128 = tpu.assume_multiple %127, 128 : i32
    %c0_89 = arith.constant 0 : index
    %c0_90 = arith.constant 0 : index
    %c0_91 = arith.constant 0 : index
    %129 = arith.index_cast %128 : i32 to index
    %130 = vector.load %arg2[%c0_89, %c0_90, %c0_91, %129] : memref<1x1x4x1300xf32, #tpu.memory_space<vmem>>, vector<1x1x4x1152xf32>
    %131 = vector.shape_cast %130 : vector<1x1x4x1152xf32> to vector<4x1152xf32>
    %132 = vector.extract_strided_slice %131 {offsets = [0, 72], sizes = [4, 1024], strides = [1, 1]} : vector<4x1152xf32> to vector<4x1024xf32>
    %c72 = arith.constant 72 : index
    %c0_92 = arith.constant 0 : index
    %133 = vector.load %arg6[%c72, %c0_92] : memref<112x1024xf32, #tpu.memory_space<vmem>>, vector<4x1024xf32>
    tpu.vector_store %arg6[%c72, %c0_92], %132 {strides = array<i32>} : memref<112x1024xf32, #tpu.memory_space<vmem>>, vector<4x1024xf32>,
    %c128_i32_93 = arith.constant 128 : i32
    %134 = arith.addi %1, %c128_i32_93 : i32
    %135 = tpu.assume_multiple %134, 128 : i32
    %c0_94 = arith.constant 0 : index
    %c0_95 = arith.constant 0 : index
    %c0_96 = arith.constant 0 : index
    %136 = arith.index_cast %135 : i32 to index
    %137 = vector.load %arg2[%c0_94, %c0_95, %c0_96, %136] : memref<1x1x4x1300xf32, #tpu.memory_space<vmem>>, vector<1x1x4x1152xf32>
    %138 = vector.shape_cast %137 : vector<1x1x4x1152xf32> to vector<4x1152xf32>
    %139 = vector.extract_strided_slice %138 {offsets = [0, 73], sizes = [4, 1024], strides = [1, 1]} : vector<4x1152xf32> to vector<4x1024xf32>
    %c76 = arith.constant 76 : index
    %c0_97 = arith.constant 0 : index
    %140 = vector.load %arg6[%c76, %c0_97] : memref<112x1024xf32, #tpu.memory_space<vmem>>, vector<4x1024xf32>
    tpu.vector_store %arg6[%c76, %c0_97], %139 {strides = array<i32>} : memref<112x1024xf32, #tpu.memory_space<vmem>>, vector<4x1024xf32>,
    %c128_i32_98 = arith.constant 128 : i32
    %141 = arith.addi %1, %c128_i32_98 : i32
    %142 = tpu.assume_multiple %141, 128 : i32
    %c0_99 = arith.constant 0 : index
    %c0_100 = arith.constant 0 : index
    %c0_101 = arith.constant 0 : index
    %143 = arith.index_cast %142 : i32 to index
    %144 = vector.load %arg2[%c0_99, %c0_100, %c0_101, %143] : memref<1x1x4x1300xf32, #tpu.memory_space<vmem>>, vector<1x1x4x1152xf32>
    %145 = vector.shape_cast %144 : vector<1x1x4x1152xf32> to vector<4x1152xf32>
    %146 = vector.extract_strided_slice %145 {offsets = [0, 74], sizes = [4, 1024], strides = [1, 1]} : vector<4x1152xf32> to vector<4x1024xf32>
    %c80 = arith.constant 80 : index
    %c0_102 = arith.constant 0 : index
    %147 = vector.load %arg6[%c80, %c0_102] : memref<112x1024xf32, #tpu.memory_space<vmem>>, vector<4x1024xf32>
    tpu.vector_store %arg6[%c80, %c0_102], %146 {strides = array<i32>} : memref<112x1024xf32, #tpu.memory_space<vmem>>, vector<4x1024xf32>,
    %c128_i32_103 = arith.constant 128 : i32
    %148 = arith.addi %1, %c128_i32_103 : i32
    %149 = tpu.assume_multiple %148, 128 : i32
    %c0_104 = arith.constant 0 : index
    %c0_105 = arith.constant 0 : index
    %c0_106 = arith.constant 0 : index
    %150 = arith.index_cast %149 : i32 to index
    %151 = vector.load %arg2[%c0_104, %c0_105, %c0_106, %150] : memref<1x1x4x1300xf32, #tpu.memory_space<vmem>>, vector<1x1x4x1152xf32>
    %152 = vector.shape_cast %151 : vector<1x1x4x1152xf32> to vector<4x1152xf32>
    %153 = vector.extract_strided_slice %152 {offsets = [0, 82], sizes = [4, 1024], strides = [1, 1]} : vector<4x1152xf32> to vector<4x1024xf32>
    %c84 = arith.constant 84 : index
    %c0_107 = arith.constant 0 : index
    %154 = vector.load %arg6[%c84, %c0_107] : memref<112x1024xf32, #tpu.memory_space<vmem>>, vector<4x1024xf32>
    tpu.vector_store %arg6[%c84, %c0_107], %153 {strides = array<i32>} : memref<112x1024xf32, #tpu.memory_space<vmem>>, vector<4x1024xf32>,
    %c128_i32_108 = arith.constant 128 : i32
    %155 = arith.addi %1, %c128_i32_108 : i32
    %156 = tpu.assume_multiple %155, 128 : i32
    %c0_109 = arith.constant 0 : index
    %c0_110 = arith.constant 0 : index
    %c0_111 = arith.constant 0 : index
    %157 = arith.index_cast %156 : i32 to index
    %158 = vector.load %arg2[%c0_109, %c0_110, %c0_111, %157] : memref<1x1x4x1300xf32, #tpu.memory_space<vmem>>, vector<1x1x4x1152xf32>
    %159 = vector.shape_cast %158 : vector<1x1x4x1152xf32> to vector<4x1152xf32>
    %160 = vector.extract_strided_slice %159 {offsets = [0, 83], sizes = [4, 1024], strides = [1, 1]} : vector<4x1152xf32> to vector<4x1024xf32>
    %c88 = arith.constant 88 : index
    %c0_112 = arith.constant 0 : index
    %161 = vector.load %arg6[%c88, %c0_112] : memref<112x1024xf32, #tpu.memory_space<vmem>>, vector<4x1024xf32>
    tpu.vector_store %arg6[%c88, %c0_112], %160 {strides = array<i32>} : memref<112x1024xf32, #tpu.memory_space<vmem>>, vector<4x1024xf32>,
    %c128_i32_113 = arith.constant 128 : i32
    %162 = arith.addi %1, %c128_i32_113 : i32
    %163 = tpu.assume_multiple %162, 128 : i32
    %c0_114 = arith.constant 0 : index
    %c0_115 = arith.constant 0 : index
    %c0_116 = arith.constant 0 : index
    %164 = arith.index_cast %163 : i32 to index
    %165 = vector.load %arg2[%c0_114, %c0_115, %c0_116, %164] : memref<1x1x4x1300xf32, #tpu.memory_space<vmem>>, vector<1x1x4x1152xf32>
    %166 = vector.shape_cast %165 : vector<1x1x4x1152xf32> to vector<4x1152xf32>
    %167 = vector.extract_strided_slice %166 {offsets = [0, 84], sizes = [4, 1024], strides = [1, 1]} : vector<4x1152xf32> to vector<4x1024xf32>
    %c92 = arith.constant 92 : index
    %c0_117 = arith.constant 0 : index
    %168 = vector.load %arg6[%c92, %c0_117] : memref<112x1024xf32, #tpu.memory_space<vmem>>, vector<4x1024xf32>
    tpu.vector_store %arg6[%c92, %c0_117], %167 {strides = array<i32>} : memref<112x1024xf32, #tpu.memory_space<vmem>>, vector<4x1024xf32>,
    %c128_i32_118 = arith.constant 128 : i32
    %169 = arith.addi %1, %c128_i32_118 : i32
    %170 = tpu.assume_multiple %169, 128 : i32
    %c0_119 = arith.constant 0 : index
    %c0_120 = arith.constant 0 : index
    %c0_121 = arith.constant 0 : index
    %171 = arith.index_cast %170 : i32 to index
    %172 = vector.load %arg2[%c0_119, %c0_120, %c0_121, %171] : memref<1x1x4x1300xf32, #tpu.memory_space<vmem>>, vector<1x1x4x1152xf32>
    %173 = vector.shape_cast %172 : vector<1x1x4x1152xf32> to vector<4x1152xf32>
    %174 = vector.extract_strided_slice %173 {offsets = [0, 92], sizes = [4, 1024], strides = [1, 1]} : vector<4x1152xf32> to vector<4x1024xf32>
    %c96 = arith.constant 96 : index
    %c0_122 = arith.constant 0 : index
    %175 = vector.load %arg6[%c96, %c0_122] : memref<112x1024xf32, #tpu.memory_space<vmem>>, vector<4x1024xf32>
    tpu.vector_store %arg6[%c96, %c0_122], %174 {strides = array<i32>} : memref<112x1024xf32, #tpu.memory_space<vmem>>, vector<4x1024xf32>,
    %c128_i32_123 = arith.constant 128 : i32
    %176 = arith.addi %1, %c128_i32_123 : i32
    %177 = tpu.assume_multiple %176, 128 : i32
    %c0_124 = arith.constant 0 : index
    %c0_125 = arith.constant 0 : index
    %c0_126 = arith.constant 0 : index
    %178 = arith.index_cast %177 : i32 to index
    %179 = vector.load %arg2[%c0_124, %c0_125, %c0_126, %178] : memref<1x1x4x1300xf32, #tpu.memory_space<vmem>>, vector<1x1x4x1152xf32>
    %180 = vector.shape_cast %179 : vector<1x1x4x1152xf32> to vector<4x1152xf32>
    %181 = vector.extract_strided_slice %180 {offsets = [0, 93], sizes = [4, 1024], strides = [1, 1]} : vector<4x1152xf32> to vector<4x1024xf32>
    %c100 = arith.constant 100 : index
    %c0_127 = arith.constant 0 : index
    %182 = vector.load %arg6[%c100, %c0_127] : memref<112x1024xf32, #tpu.memory_space<vmem>>, vector<4x1024xf32>
    tpu.vector_store %arg6[%c100, %c0_127], %181 {strides = array<i32>} : memref<112x1024xf32, #tpu.memory_space<vmem>>, vector<4x1024xf32>,
    %c128_i32_128 = arith.constant 128 : i32
    %183 = arith.addi %1, %c128_i32_128 : i32
    %184 = tpu.assume_multiple %183, 128 : i32
    %c0_129 = arith.constant 0 : index
    %c0_130 = arith.constant 0 : index
    %c0_131 = arith.constant 0 : index
    %185 = arith.index_cast %184 : i32 to index
    %186 = vector.load %arg2[%c0_129, %c0_130, %c0_131, %185] : memref<1x1x4x1300xf32, #tpu.memory_space<vmem>>, vector<1x1x4x1152xf32>
    %187 = vector.shape_cast %186 : vector<1x1x4x1152xf32> to vector<4x1152xf32>
    %188 = vector.extract_strided_slice %187 {offsets = [0, 94], sizes = [4, 1024], strides = [1, 1]} : vector<4x1152xf32> to vector<4x1024xf32>
    %c104 = arith.constant 104 : index
    %c0_132 = arith.constant 0 : index
    %189 = vector.load %arg6[%c104, %c0_132] : memref<112x1024xf32, #tpu.memory_space<vmem>>, vector<4x1024xf32>
    tpu.vector_store %arg6[%c104, %c0_132], %188 {strides = array<i32>} : memref<112x1024xf32, #tpu.memory_space<vmem>>, vector<4x1024xf32>,
    %cst = arith.constant 0.000000e+00 : f32
    %190 = vector.broadcast %cst : f32 to vector<4x1024xf32>
    %c108 = arith.constant 108 : index
    %c0_133 = arith.constant 0 : index
    %191 = vector.load %arg6[%c108, %c0_133] : memref<112x1024xf32, #tpu.memory_space<vmem>>, vector<4x1024xf32>
    tpu.vector_store %arg6[%c108, %c0_133], %190 {strides = array<i32>} : memref<112x1024xf32, #tpu.memory_space<vmem>>, vector<4x1024xf32>,
    %c0_134 = arith.constant 0 : index
    %c0_135 = arith.constant 0 : index
    %192 = vector.load %arg3[%c0_134, %c0_135] : memref<8x112xf32, #tpu.memory_space<vmem>>, vector<8x112xf32>
    %c0_136 = arith.constant 0 : index
    %c0_137 = arith.constant 0 : index
    %193 = vector.load %arg6[%c0_136, %c0_137] : memref<112x1024xf32, #tpu.memory_space<vmem>>, vector<112x1024xf32>
    %cst_138 = arith.constant dense<0.000000e+00> : vector<8x1024xf32>
    %194 = tpu.matmul %192, %193, %cst_138 {dimension_numbers = #tpu.dot_dimension_numbers<[1], [0], [0], [1], [0, 0, 1, 1], [], []>} : vector<8x112xf32>, vector<112x1024xf32>, vector<8x1024xf32> -> vector<8x1024xf32>
    %c0_139 = arith.constant 0 : index
    %c0_140 = arith.constant 0 : index
    %195 = vector.load %arg4[%c0_139, %c0_140] : memref<8x1xf32, #tpu.memory_space<vmem>>, vector<8x1xf32>
    %196 = vector.broadcast %195 : vector<8x1xf32> to vector<8x1024xf32>
    %197 = arith.addf %194, %196 : vector<8x1024xf32>
    %cst_141 = arith.constant 0.000000e+00 : f32
    %198 = vector.broadcast %cst_141 : f32 to vector<8x1024xf32>
    %199 = arith.cmpf oge, %197, %198 : vector<8x1024xf32>
    %cst_142 = arith.constant 0.00999999977 : f32
    %200 = vector.broadcast %cst_142 : f32 to vector<8x1024xf32>
    %201 = arith.mulf %200, %197 : vector<8x1024xf32>
    %202 = arith.select %199, %197, %201 : vector<8x1024xi1>, vector<8x1024xf32>
    %c0_143 = arith.constant 0 : index
    %c0_144 = arith.constant 0 : index
    %c0_145 = arith.constant 0 : index
    %203 = vector.load %arg5[%c0_143, %c0_144, %c0_145] : memref<1x8x1024xf32, #tpu.memory_space<vmem>>, vector<1x8x1024xf32>
    %204 = vector.shape_cast %203 : vector<1x8x1024xf32> to vector<8x1024xf32>
    %205 = vector.shape_cast %202 : vector<8x1024xf32> to vector<1x8x1024xf32>
    tpu.vector_store %arg5[%c0_143, %c0_144, %c0_145], %205 {strides = array<i32>} : memref<1x8x1024xf32, #tpu.memory_space<vmem>>, vector<1x8x1024xf32>,
    return
  }
  func.func @transform_0(%arg0: i32, %arg1: i32) -> (i32, i32, i32, i32) {
    %c0_i32 = arith.constant 0 : i32
    %c0_i32_0 = arith.constant 0 : i32
    %c0_i32_1 = arith.constant 0 : i32
    %c0_i32_2 = arith.constant 0 : i32
    return %arg0, %c0_i32, %c0_i32_0, %c0_i32_1 : i32, i32, i32, i32
  }
  func.func @transform_1(%arg0: i32, %arg1: i32) -> (i32, i32) {
    %c0_i32 = arith.constant 0 : i32
    %c0_i32_0 = arith.constant 0 : i32
    %c0_i32_1 = arith.constant 0 : i32
    return %c0_i32, %c0_i32_0 : i32, i32
  }
  func.func @transform_2(%arg0: i32, %arg1: i32) -> (i32, i32) {
    %c0_i32 = arith.constant 0 : i32
    %c0_i32_0 = arith.constant 0 : i32
    %c0_i32_1 = arith.constant 0 : i32
    return %c0_i32, %c0_i32_0 : i32, i32
  }
  func.func @transform_3(%arg0: i32, %arg1: i32) -> (i32, i32, i32) {
    %c0_i32 = arith.constant 0 : i32
    %c0_i32_0 = arith.constant 0 : i32
    return %arg0, %c0_i32, %arg1 : i32, i32, i32
  }
}

</mosaic_0001>

<bundles_post_ra>
// kernel: tpu_custom_call.1
= control target key start
LH: loop header
LB: loop body
LE: loop exit
PB: predicated region body
PF: predicated region fallthrough
CT: control target
= control target key end

     0   :  { %8 = vsyncpa [#allocation4], 0  ;;  %s3645_s0 = inlined_call_operand.hbm [shape: f32[2,1,4,1300], index: 0, kind: input, shape index: {}]   ;;  %s3646_s1 = inlined_call_operand.vmem [shape: f32[8,112], index: 1, kind: input, shape index: {}]   ;;  %s3647_s2 = inlined_call_operand.vmem [shape: f32[8,1], index: 2, kind: input, shape index: {}]   ;;  %s3648_s3 = inlined_call_operand.hbm [shape: f32[2,8,1024], index: 3, kind: output, shape index: {}]  }
   0x1   :  { %10 = vsyncpa [#allocation4 + $0x1], 0 }
   0x2   :  { %11 = vsyncpa [#allocation5], 0 }
   0x3   :  { %13 = vsyncpa [#allocation5 + $0x1], 0  ;;  %s2640_s12 = smov 0   ;;  %s2642_s13 = smov 0  }
   0x4   :  { %s2644_s14 = smov 0   ;;  %s2646_s15 = smov 0  }
   0x5   :  { %s2648_s16 = smov 0   ;;  %s2650_s17 = smov 0  }
   0x6 LB: > { %s2280_s18 = sadd.s32 4294967295, %s2588_s17   ;;  %s2281_s19 = sadd.s32 4294967294, %s2588_s17   ;;  %s2588_s17 = sphi %s2650_s17, %s19_s17   ;;  %s2584_s16 = sphi %s2648_s16, %s3679_s16   ;;  %s2580_s15 = sphi %s2646_s15, %s3678_s15   ;;  %s2576_s14 = sphi %s2644_s14, %s3677_s14   ;;  %s2572_s13 = sphi %s2642_s13, %s3676_s13   ;;  %s2568_s12 = sphi %s2640_s12, %s3675_s12  }
   0x7   : > { %s31_s20 = sadd.s32 1, %s2584_s16  ;;  %s38_s21 = sadd.s32 1, %s2576_s14 }
   0x8   : > { %p33_p0 = scmp.ge.s32.totalorder %s31_s20, 2  ;;  %p45_p1 = scmp.ne.s32.totalorder %s2576_s14, %s2572_s13 }
   0x9   : > { %p46_p2 = scmp.eq.s32.totalorder %s2588_s17, 0  ;;  %p51_p3 = scmp.ne.s32.totalorder %s2572_s13, %s2568_s12 }
   0xa   : > { %s3681_s20 = smov (%p33_p0, %s31_s20), 0  ;;  %p52_p5 = scmp.eq.s32.totalorder %s2280_s18, 0 }
   0xb   : > { %p2681_p4 = por %p46_p2, %p45_p1  ;;  %s35_s23 = ssub.s32 %s2584_s16, %s3681_s20 }
   0xc   : > { %p119_p6 = scmp.eq.s32.totalorder %s2280_s18, 1  ;;  %p36_p7 = scmp.eq.s32.totalorder %s35_s23, 0 }
   0xd   : > { %p2687_p8 = por %p52_p5, %p51_p3  ;;  %p125_p10 = scmp.eq.s32.totalorder %s2281_s19, 1 }
   0xe   : > { %p2691_p9 = por %p119_p6, %p45_p1  ;;  %p2357_p13 = scmp.lt.s32.totalorder %s2588_s17, 2 }
   0xf   : > { %s2696_s26 = scalar_select %p36_p7, %s2576_s14, %s38_s21  }
  0x10   : > { %p2698_p11 = por %p125_p10, %p51_p3  ;;  %s151_s28 = sand.u32 1, %s2576_s14  }
  0x11   : > { %s2342_s29 = smul.u32 44, %s151_s28  ;;  %p2708_p0 = pnand %p2357_p13, %p2681_p4 }
  0x12   : > { %s3660_s27 = scalar_select %p2698_p11, 1, 0 }
  0x13   : > { %s2343_s30 = smul.u32 704, %s2584_s16  ;;  %p2285_p1 = scmp.ge.s32.totalorder %s2588_s17, 1 }
  0x14   : > { %s155_s8 = scalar_lea.vmem [#allocation3], %s2342_s29  ;;  %s152_s10 = scalar_lea.sflag [#allocation4], %s151_s28 }
  0x15   : > { %s161_s7 = scalar_lea.hbm %s3645_s0, %s2343_s30  ;;  %s163_s9 = sshll.u32 %s155_s8, 4  ;;  %s164_s9 = int_to_ptr.vmem [resolvable:$true] %s163_s9 }
  0x16   : > { %p2482_p2 = pneg %p2708_p0  ;;  %s2493_s11 = scalar_lea.vmem %s164_s9, 704 }
  0x17   : > { %p2494_p3 = scmp.ne.s32.totalorder %s164_s9, %s2493_s11  ;;  %s2590_s18 = smov [#allocation3]  }
  0x18   : > { %s2498_s19 = sshll.u32 %s2590_s18, 4  ;;  %s2499_s19 = int_to_ptr.vmem [resolvable:$false] %s2498_s19 }
  0x19   : > { %p2496_p5 = pnand %p2494_p3, %p2482_p2  ;;  %s2500_s21 = scalar_lea.vmem %s2499_s19, 1408 }
  0x1a   : > { %p2501_p4 = scmp.lt.s32.totalorder %s164_s9, %s2499_s19  ;;  %p2502_p7 = scmp.lt.s32.totalorder %s2500_s21, %s2493_s11 }
  0x1b   : > { %p2497_p6 = pneg %p2496_p5 }
  0x1c   : > { %p2503_p10 = por %p2502_p7, %p2501_p4 }
  0x1e   : > { %p2504_p13 = pnand %p2503_p10, %p2497_p6 }
  0x20   : > { %2507 = shalt.err (!%p2504_p13)
}
  0x21   : > { %2352 = dma.hbm_to_vmem [thread:$0]  (!%p2708_p0), %s161_s7, 704, %s164_s9, %s152_s10  }
  0x22   : > { %p168_p12 = scmp.lt.s32.totalorder %s2588_s17, 3 }
  0x24   : > { %p169_p11 = pnand %p2285_p1, %p168_p12 }
  0x25   : > { %s2724_s22 = sand.u32 (!%p169_p11), 1, %s2572_s13  }
  0x26   : > { %172 = sbr.rel (%p169_p11) target bundleno = 860 (0x35c), region = 32  ;;  %s175_s28 = scalar_lea.sflag (!%p169_p11), [#allocation4], %s2724_s22 }
  0x27   : > { %s2344_s23 = smul.u32 (!%p169_p11), 44, %s2724_s22 }
  0x29   : > { %s2728_s29 = scalar_lea.vmem (!%p169_p11), [#allocation3], %s2344_s23 }
  0x2b   : > { %2559 = dma.done.wait (%p2687_p8), %s175_s28, 704  }
  0x2c   : > { %2561 = vsyncadd (%p2687_p8), %s175_s28, 4294966592  ;;  %v2735_v0 = vld [vmem:[%s2728_s29 + $0x8] sm:$0xff]  ;;  %v2738_v1 = vld [vmem:[%s2728_s29] sm:$0xff]  ;;  %s2591_s30 = smov 127   ;;  %s2592_s24 = smov 126   ;;  %vm264_vm0 = vcmask 1039360  }
  0x2d   : > { %252 = vrot.lane.b32.xlu1 %v2735_v0, %s2591_s30  ;;  %248 = vrot.lane.b32.xlu0 %v2738_v1, %s2591_s30  ;;  %v2746_v2 = vcombine.low %v2738_v1, %v2738_v1  ;;  %v2749_v3 = vld [vmem:[%s2728_s29 + $0x10] sm:$0xff]  ;;  %v2753_v4 = vcombine.low %v2735_v0, %v2735_v0  ;;  %v2764_v6 = vld [vmem:[%s2728_s29 + $0x18] sm:$0xff]  ;;  %v2785_v17 = vcombine.high %v2738_v1, %v2738_v1  ;;  %s2593_s4 = smov 118   ;;  %s2594_s5 = smov 117   ;;  %vm321_vm1 = vcmask 1031168  }
  0x2e   : > { %v2757_v5 = vcombine.low %v2749_v3, %v2749_v3  ;;  %v207_v7 = vld [vmem:[%s2728_s29] sm:$0xff]  ;;  %v208_v9 = vld [vmem:[%s2728_s29 + $0x8] sm:$0xff]  ;;  %v2774_v10 = vcombine.low %v2764_v6, %v2764_v6  ;;  %v209_v12 = vld [vmem:[%s2728_s29 + $0x10] sm:$0xff]  ;;  %v2791_v18 = vcombine.high %v2735_v0, %v2735_v0  ;;  %v2797_v19 = vcombine.high %v2749_v3, %v2749_v3  ;;  %s2595_s6 = smov 116   ;;  %s2596_s7 = smov 108  }
  0x2f   : > { %v215_v8 = vcombine.high %v207_v7, %v207_v7  ;;  %223 = vst [vmem:[#allocation2 + $0x2b0] sm:$0xf] %v207_v7  ;;  %v216_v11 = vcombine.high %v208_v9, %v208_v9  ;;  %225 = vst [vmem:[#allocation2 + $0x10] sm:$0xf] %v208_v9  ;;  %v217_v13 = vcombine.high %v209_v12, %v209_v12  ;;  %v210_v14 = vld [vmem:[%s2728_s29 + $0x18] sm:$0xff]  ;;  %s2597_s8 = smov 107  }
  0x30   : > { %227 = vst [vmem:[#allocation2 + $0x360] sm:$0xf] %v209_v12  ;;  %v218_v15 = vcombine.high %v210_v14, %v210_v14  ;;  %229 = vst [vmem:[#allocation2 + $0x40] sm:$0xf] %v210_v14  ;;  %v2441_v16 = vld [vmem:[%s2728_s29 + $0x20] ss:$0 sps:$4 sm:$0xff]   ;;  %v2803_v20 = vcombine.high %v2764_v6, %v2764_v6 }
  0x31   : > { %256 = vrot.lane.b32.xlu1 %v2749_v3, %s2591_s30  ;;  %246 = vrot.lane.b32.xlu0 %v2746_v2, %s2591_s30  ;;  %224 = vst [vmem:[#allocation2 + $0xd0] sm:$0xf] %v215_v8  ;;  %226 = vst [vmem:[#allocation2 + $0x48] sm:$0xf] %v216_v11  ;;  %v293_v21 = vld [vmem:[%s2728_s29 + $0x20] sm:$0xf] }
  0x32   : > { %228 = vst [vmem:[#allocation2 + $0x328] sm:$0xf] %v217_v13  ;;  %230 = vst [vmem:[#allocation2 + $0x378] sm:$0xf] %v218_v15  ;;  %v2445_v22 = vld [vmem:[%s2728_s29 + $0x20] ss:$0 sps:$4 sm:$0xff]  }
  0x33   : > { %v408_v23 = vld [vmem:[%s2728_s29 + $0x20] sm:$0xf]  ;;  %s2598_s9 = smov 106   ;;  %v2599_v49 = vmov 0.0   ;;  %v2895_v55 = vld [vmem:[%s2728_s29 + $0x4] sm:$0xff]  ;;  %s2600_s10 = smov 28  }
  0x34   : > { %v2446_v24 = vld [vmem:[%s2728_s29 + $0x20] ss:$0 sps:$4 sm:$0xff]   ;;  %1732 = vst [vmem:[#allocation2 + $0x220] sm:$0xf0] %v2599_v49  ;;  %1731 = vst [vmem:[#allocation2 + $0x190] sm:$0xf0] %v2599_v49  ;;  %1926 = vmatprep.mubr.f32.mxu0 %v2599_v49  ;;  %1997 = vmatprep.mubr.f32.mxu1 %v2599_v49  ;;  %v2905_v60 = vcombine.high %v2895_v55, %v2895_v55 }
  0x35   : > { %250 = vrot.lane.b32.xlu1 %v2753_v4, %s2591_s30  ;;  %254 = vrot.lane.b32.xlu0 %v2757_v5, %s2591_s30  ;;  %v523_v25 = vld [vmem:[%s2728_s29 + $0x20] sm:$0xf]  ;;  %1733 = vst [vmem:[#allocation2 + $0x8] sm:$0xf0] %v2599_v49  ;;  %1734 = vst [vmem:[#allocation2 + $0x18] sm:$0xf0] %v2599_v49 }
  0x36   : > { %v2447_v31 = vld [vmem:[%s2728_s29 + $0x20] ss:$0 sps:$4 sm:$0xff]   ;;  %1735 = vst [vmem:[#allocation2] sm:$0xf0] %v2599_v49  ;;  %1736 = vst [vmem:[#allocation2 + $0x2a0] sm:$0xf0] %v2599_v49 }
  0x37   : > { %1737 = vst [vmem:[#allocation2 + $0x1b0] sm:$0xf0] %v2599_v49  ;;  %1738 = vst [vmem:[#allocation2 + $0x150] sm:$0xf0] %v2599_v49  ;;  %v638_v50 = vld [vmem:[%s2728_s29 + $0x20] sm:$0xf] }
  0x38   : > { %v2908_v61 = vld [vmem:[%s2728_s29 + $0xc] sm:$0xff]  ;;  %s2601_s11 = smov 34   ;;  %vm379_vm2 = vcmask 965632   ;;  %v2921_v9 = vld [vmem:[%s2728_s29 + $0x14] sm:$0xff]  ;;  %s2602_s18 = smov 36   ;;  %vm436_vm3 = vcmask 957440  }
  0x39   : > { %260 = vrot.lane.b32.xlu1 %v2764_v6, %s2591_s30  ;;  %258 = vrot.lane.b32.xlu0 %v2774_v10, %s2591_s30  ;;  %v2914_v8 = vcombine.high %v2908_v61, %v2908_v61  ;;  %s2603_s19 = smov 35   ;;  %s2604_s21 = smov 45   ;;  %vm494_vm4 = vcmask 949248   ;;  %vm551_vm5 = vcmask 883712   ;;  %vm609_vm6 = vcmask 875520  }
  0x3a   : > { %s2605_s23 = smov 44   ;;  %s2606_s28 = smov 54   ;;  %vm666_vm7 = vcmask 867328   ;;  %vm724_vm8 = vcmask 228352   ;;  %vm1706_vm9 = vcmask 277504   ;;  %vm1591_vm10 = vcmask 293888  }
  0x3b   : > { %vm1649_vm11 = vcmask 285696   ;;  %vm1476_vm12 = vcmask 367616   ;;  %vm1534_vm13 = vcmask 359424   ;;  %vm1361_vm14 = vcmask 441344  }
  0x3c   : > { %vm1419_vm15 = vcmask 375808  }
  0x3d   : > { %303 = vrot.lane.b32.xlu1 %v2738_v1, %s2592_s24  ;;  %262 = vrot.lane.b32.xlu0 %v2441_v16, %s2591_s30  ;;  %s2607_s30 = smov 46  }
  0x41   : > { %307 = vrot.lane.b32.xlu1 %v2735_v0, %s2592_s24  ;;  %305 = vrot.lane.b32.xlu0 %v2785_v17, %s2592_s24 }
  0x45   : > { %311 = vrot.lane.b32.xlu1 %v2749_v3, %s2592_s24  ;;  %309 = vrot.lane.b32.xlu0 %v2791_v18, %s2592_s24 }
  0x49   : > { %315 = vrot.lane.b32.xlu1 %v2764_v6, %s2592_s24  ;;  %313 = vrot.lane.b32.xlu0 %v2797_v19, %s2592_s24 }
  0x4d   : > { %319 = vrot.lane.b32.xlu1 %v293_v21, %s2592_s24  ;;  %317 = vrot.lane.b32.xlu0 %v2803_v20, %s2592_s24  ;;  %s2608_s24 = smov 56  }
  0x51   : > { %363 = vrot.lane.b32.xlu1 %v2738_v1, %s2593_s4  ;;  %361 = vrot.lane.b32.xlu0 %v2746_v2, %s2593_s4 }
  0x55   : > { %367 = vrot.lane.b32.xlu1 %v2735_v0, %s2593_s4  ;;  %365 = vrot.lane.b32.xlu0 %v2753_v4, %s2593_s4 }
  0x59   : > { %371 = vrot.lane.b32.xlu1 %v2749_v3, %s2593_s4  ;;  %369 = vrot.lane.b32.xlu0 %v2757_v5, %s2593_s4 }
  0x5d   : > { %375 = vrot.lane.b32.xlu1 %v2764_v6, %s2593_s4  ;;  %373 = vrot.lane.b32.xlu0 %v2774_v10, %s2593_s4 }
  0x61   : > { %418 = vrot.lane.b32.xlu1 %v2738_v1, %s2594_s5  ;;  %377 = vrot.lane.b32.xlu0 %v2445_v22, %s2593_s4  ;;  %s2609_s4 = smov 55  }
  0x65   : > { %422 = vrot.lane.b32.xlu1 %v2735_v0, %s2594_s5  ;;  %420 = vrot.lane.b32.xlu0 %v2785_v17, %s2594_s5 }
  0x69   : > { %426 = vrot.lane.b32.xlu1 %v2749_v3, %s2594_s5  ;;  %424 = vrot.lane.b32.xlu0 %v2791_v18, %s2594_s5 }
  0x6d   : > { %430 = vrot.lane.b32.xlu1 %v2764_v6, %s2594_s5  ;;  %428 = vrot.lane.b32.xlu0 %v2797_v19, %s2594_s5 }
  0x71   : > { %434 = vrot.lane.b32.xlu1 %v408_v23, %s2594_s5  ;;  %432 = vrot.lane.b32.xlu0 %v2803_v20, %s2594_s5  ;;  %s2610_s5 = smov 7  }
  0x75   : > { %478 = vrot.lane.b32.xlu1 %v2738_v1, %s2595_s6  ;;  %476 = vrot.lane.b32.xlu0 %v2746_v2, %s2595_s6 }
  0x79   : > { %482 = vrot.lane.b32.xlu1 %v2735_v0, %s2595_s6  ;;  %480 = vrot.lane.b32.xlu0 %v2753_v4, %s2595_s6 }
  0x7d   : > { %486 = vrot.lane.b32.xlu1 %v2749_v3, %s2595_s6  ;;  %484 = vrot.lane.b32.xlu0 %v2757_v5, %s2595_s6 }
  0x81   : > { %490 = vrot.lane.b32.xlu1 %v2764_v6, %s2595_s6  ;;  %488 = vrot.lane.b32.xlu0 %v2774_v10, %s2595_s6 }
  0x85   : > { %533 = vrot.lane.b32.xlu1 %v2738_v1, %s2596_s7  ;;  %492 = vrot.lane.b32.xlu0 %v2446_v24, %s2595_s6  ;;  %s2611_s6 = smov 6  }
  0x89   : > { %537 = vrot.lane.b32.xlu1 %v2735_v0, %s2596_s7  ;;  %535 = vrot.lane.b32.xlu0 %v2785_v17, %s2596_s7 }
  0x8d   : > { %541 = vrot.lane.b32.xlu1 %v2749_v3, %s2596_s7  ;;  %539 = vrot.lane.b32.xlu0 %v2791_v18, %s2596_s7 }
  0x91   : > { %545 = vrot.lane.b32.xlu1 %v2764_v6, %s2596_s7  ;;  %543 = vrot.lane.b32.xlu0 %v2797_v19, %s2596_s7 }
  0x95   : > { %549 = vrot.lane.b32.xlu1 %v523_v25, %s2596_s7  ;;  %547 = vrot.lane.b32.xlu0 %v2803_v20, %s2596_s7  ;;  %s3651_s7 = smov 16  }
  0x99   : > { %593 = vrot.lane.b32.xlu1 %v2738_v1, %s2597_s8  ;;  %591 = vrot.lane.b32.xlu0 %v2746_v2, %s2597_s8 }
  0x9d   : > { %597 = vrot.lane.b32.xlu1 %v2735_v0, %s2597_s8  ;;  %595 = vrot.lane.b32.xlu0 %v2753_v4, %s2597_s8 }
  0x9f   : > { %v253_v26 = vpop.permute.xlu1 %252  ;;  %v249_v27 = vpop.permute.xlu0 %248 }
  0xa1   : > { %601 = vrot.lane.b32.xlu1 %v2749_v3, %s2597_s8  ;;  %599 = vrot.lane.b32.xlu0 %v2757_v5, %s2597_s8 }
  0xa3   : > { %v257_v28 = vpop.permute.xlu1 %256  ;;  %v247_v29 = vpop.permute.xlu0 %246 }
  0xa4   : > { %v265_v30 = vsel %vm264_vm0, %v247_v29, %v249_v27 }
  0xa5   : > { %281 = vst [vmem:[#allocation2 + $0x2b0] sm:$0xf0] %v265_v30  ;;  %605 = vrot.lane.b32.xlu1 %v2764_v6, %s2597_s8  ;;  %603 = vrot.lane.b32.xlu0 %v2774_v10, %s2597_s8 }
  0xa7   : > { %v251_v32 = vpop.permute.xlu1 %250  ;;  %v255_v33 = vpop.permute.xlu0 %254 }
  0xa8   : > { %v266_v34 = vsel %vm264_vm0, %v249_v27, %v251_v32  ;;  %v267_v35 = vsel %vm264_vm0, %v251_v32, %v253_v26  ;;  %v268_v36 = vsel %vm264_vm0, %v253_v26, %v255_v33  ;;  %v269_v37 = vsel %vm264_vm0, %v255_v33, %v257_v28 }
  0xa9   : > { %282 = vst [vmem:[#allocation2 + $0xd0] sm:$0xf0] %v266_v34  ;;  %283 = vst [vmem:[#allocation2 + $0x10] sm:$0xf0] %v267_v35  ;;  %648 = vrot.lane.b32.xlu1 %v2738_v1, %s2598_s9  ;;  %607 = vrot.lane.b32.xlu0 %v2447_v31, %s2597_s8  ;;  %v2957_v32 = vcombine.low %v2921_v9, %v2921_v9  ;;  %s3649_s8 = smov 8  }
  0xaa   : > { %284 = vst [vmem:[#allocation2 + $0x48] sm:$0xf0] %v268_v36  ;;  %285 = vst [vmem:[#allocation2 + $0x360] sm:$0xf0] %v269_v37  ;;  %v2963_v37 = vcombine.low %v2895_v55, %v2895_v55 }
  0xab   : > { %v261_v38 = vpop.permute.xlu1 %260  ;;  %v259_v39 = vpop.permute.xlu0 %258 }
  0xac   : > { %v270_v40 = vsel %vm264_vm0, %v257_v28, %v259_v39  ;;  %v271_v41 = vsel %vm264_vm0, %v259_v39, %v261_v38  ;;  %v2948_v28 = vcombine.low %v2908_v61, %v2908_v61 }
  0xad   : > { %286 = vst [vmem:[#allocation2 + $0x328] sm:$0xf0] %v270_v40  ;;  %287 = vst [vmem:[#allocation2 + $0x40] sm:$0xf0] %v271_v41  ;;  %652 = vrot.lane.b32.xlu1 %v2735_v0, %s2598_s9  ;;  %650 = vrot.lane.b32.xlu0 %v2785_v17, %s2598_s9 }
  0xaf   : > { %v304_v42 = vpop.permute.xlu1 %303  ;;  %v263_v43 = vpop.permute.xlu0 %262 }
  0xb0   : > { %v272_v44 = vsel %vm264_vm0, %v261_v38, %v263_v43  ;;  %vm1246_vm0 = vcmask 457728  }
  0xb1   : > { %288 = vst [vmem:[#allocation2 + $0x378] sm:$0xf0] %v272_v44  ;;  %656 = vrot.lane.b32.xlu1 %v2749_v3, %s2598_s9  ;;  %654 = vrot.lane.b32.xlu0 %v2791_v18, %s2598_s9 }
  0xb3   : > { %v308_v45 = vpop.permute.xlu1 %307  ;;  %v306_v46 = vpop.permute.xlu0 %305 }
  0xb4   : > { %v322_v47 = vsel %vm321_vm1, %v304_v42, %v306_v46  ;;  %v323_v48 = vsel %vm321_vm1, %v306_v46, %v308_v45 }
  0xb5   : > { %338 = vst [vmem:[#allocation2 + $0x108] sm:$0xf] %v322_v47  ;;  %339 = vst [vmem:[#allocation2 + $0x110] sm:$0xf] %v323_v48  ;;  %660 = vrot.lane.b32.xlu1 %v2764_v6, %s2598_s9  ;;  %658 = vrot.lane.b32.xlu0 %v2797_v19, %s2598_s9 }
  0xb7   : > { %v312_v51 = vpop.permute.xlu1 %311  ;;  %v310_v52 = vpop.permute.xlu0 %309 }
  0xb8   : > { %v324_v53 = vsel %vm321_vm1, %v308_v45, %v310_v52  ;;  %v325_v54 = vsel %vm321_vm1, %v310_v52, %v312_v51 }
  0xb9   : > { %340 = vst [vmem:[#allocation2 + $0x90] sm:$0xf] %v324_v53  ;;  %341 = vst [vmem:[#allocation2 + $0x318] sm:$0xf] %v325_v54  ;;  %664 = vrot.lane.b32.xlu1 %v638_v50, %s2598_s9  ;;  %662 = vrot.lane.b32.xlu0 %v2803_v20, %s2598_s9  ;;  %s2614_s9 = smov 18  }
  0xbb   : > { %v316_v56 = vpop.permute.xlu1 %315  ;;  %v314_v57 = vpop.permute.xlu0 %313 }
  0xbc   : > { %v326_v58 = vsel %vm321_vm1, %v312_v51, %v314_v57  ;;  %v327_v59 = vsel %vm321_vm1, %v314_v57, %v316_v56 }
  0xbd   : > { %342 = vst [vmem:[#allocation2 + $0x148] sm:$0xf] %v326_v58  ;;  %343 = vst [vmem:[#allocation2 + $0x100] sm:$0xf] %v327_v59  ;;  %708 = vrot.lane.b32.xlu1 %v2738_v1, %s2600_s10  ;;  %706 = vrot.lane.b32.xlu0 %v2746_v2, %s2600_s10 }
  0xbf   : > { %v320_v62 = vpop.permute.xlu1 %319  ;;  %v318_v63 = vpop.permute.xlu0 %317 }
  0xc0   : > { %v328_v6 = vsel %vm321_vm1, %v316_v56, %v318_v63  ;;  %v329_v7 = vsel %vm321_vm1, %v318_v63, %v320_v62  ;;  %vm1304_vm1 = vcmask 449536  }
  0xc1   : > { %344 = vst [vmem:[#allocation2 + $0x58] sm:$0xf] %v328_v6  ;;  %345 = vst [vmem:[#allocation2 + $0x2d8] sm:$0xf] %v329_v7  ;;  %1692 = vrot.lane.b32.xlu1 %v2908_v61, %s2601_s11  ;;  %1690 = vrot.lane.b32.xlu0 %v2905_v60, %s2601_s11 }
  0xc3   : > { %v364_v10 = vpop.permute.xlu1 %363  ;;  %v362_v11 = vpop.permute.xlu0 %361 }
  0xc4   : > { %v380_v12 = vsel %vm379_vm2, %v362_v11, %v364_v10 }
  0xc5   : > { %396 = vst [vmem:[#allocation2 + $0x108] sm:$0xf0] %v380_v12  ;;  %1696 = vrot.lane.b32.xlu1 %v2921_v9, %s2601_s11  ;;  %1694 = vrot.lane.b32.xlu0 %v2914_v8, %s2601_s11 }
  0xc7   : > { %v368_v13 = vpop.permute.xlu1 %367  ;;  %v366_v14 = vpop.permute.xlu0 %365 }
  0xc8   : > { %v381_v15 = vsel %vm379_vm2, %v364_v10, %v366_v14  ;;  %v382_v16 = vsel %vm379_vm2, %v366_v14, %v368_v13 }
  0xc9   : > { %397 = vst [vmem:[#allocation2 + $0x110] sm:$0xf0] %v381_v15  ;;  %398 = vst [vmem:[#allocation2 + $0x90] sm:$0xf0] %v382_v16  ;;  %1575 = vrot.lane.b32.xlu1 %v2905_v60, %s2602_s18  ;;  %1688 = vrot.lane.b32.xlu0 %v2895_v55, %s2601_s11 }
  0xcb   : > { %v372_v20 = vpop.permute.xlu1 %371  ;;  %v370_v21 = vpop.permute.xlu0 %369 }
  0xcc   : > { %v383_v22 = vsel %vm379_vm2, %v368_v13, %v370_v21  ;;  %v384_v23 = vsel %vm379_vm2, %v370_v21, %v372_v20 }
  0xcd   : > { %399 = vst [vmem:[#allocation2 + $0x318] sm:$0xf0] %v383_v22  ;;  %400 = vst [vmem:[#allocation2 + $0x148] sm:$0xf0] %v384_v23  ;;  %1579 = vrot.lane.b32.xlu1 %v2914_v8, %s2602_s18  ;;  %1577 = vrot.lane.b32.xlu0 %v2908_v61, %s2602_s18 }
  0xcf   : > { %v376_v24 = vpop.permute.xlu1 %375  ;;  %v374_v25 = vpop.permute.xlu0 %373 }
  0xd0   : > { %v385_v26 = vsel %vm379_vm2, %v372_v20, %v374_v25  ;;  %v386_v27 = vsel %vm379_vm2, %v374_v25, %v376_v24 }
  0xd1   : > { %401 = vst [vmem:[#allocation2 + $0x100] sm:$0xf0] %v385_v26  ;;  %402 = vst [vmem:[#allocation2 + $0x58] sm:$0xf0] %v386_v27  ;;  %1633 = vrot.lane.b32.xlu1 %v2895_v55, %s2603_s19  ;;  %1581 = vrot.lane.b32.xlu0 %v2921_v9, %s2602_s18 }
  0xd3   : > { %v419_v29 = vpop.permute.xlu1 %418  ;;  %v378_v30 = vpop.permute.xlu0 %377 }
  0xd4   : > { %v387_v31 = vsel %vm379_vm2, %v376_v24, %v378_v30  ;;  %vm1126_vm2 = vcmask 56320  }
  0xd5   : > { %403 = vst [vmem:[#allocation2 + $0x2d8] sm:$0xf0] %v387_v31  ;;  %1637 = vrot.lane.b32.xlu1 %v2908_v61, %s2603_s19  ;;  %1635 = vrot.lane.b32.xlu0 %v2948_v28, %s2603_s19 }
  0xd7   : > { %v423_v33 = vpop.permute.xlu1 %422  ;;  %v421_v34 = vpop.permute.xlu0 %420 }
  0xd8   : > { %v437_v35 = vsel %vm436_vm3, %v419_v29, %v421_v34  ;;  %v438_v36 = vsel %vm436_vm3, %v421_v34, %v423_v33 }
  0xd9   : > { %453 = vst [vmem:[#allocation2 + $0x28] sm:$0xf] %v437_v35  ;;  %454 = vst [vmem:[#allocation2 + $0x330] sm:$0xf] %v438_v36  ;;  %1573 = vrot.lane.b32.xlu1 %v2895_v55, %s2602_s18  ;;  %1639 = vrot.lane.b32.xlu0 %v2957_v32, %s2603_s19 }
  0xdb   : > { %v427_v38 = vpop.permute.xlu1 %426  ;;  %v425_v39 = vpop.permute.xlu0 %424 }
  0xdc   : > { %v439_v40 = vsel %vm436_vm3, %v423_v33, %v425_v39  ;;  %v440_v41 = vsel %vm436_vm3, %v425_v39, %v427_v38 }
  0xdd   : > { %455 = vst [vmem:[#allocation2 + $0x2d0] sm:$0xf] %v439_v40  ;;  %456 = vst [vmem:[#allocation2 + $0x198] sm:$0xf] %v440_v41  ;;  %1460 = vrot.lane.b32.xlu1 %v2905_v60, %s2604_s21  ;;  %1631 = vrot.lane.b32.xlu0 %v2963_v37, %s2603_s19 }
  0xdf   : > { %v431_v42 = vpop.permute.xlu1 %430  ;;  %v429_v43 = vpop.permute.xlu0 %428 }
  0xe0   : > { %v441_v44 = vsel %vm436_vm3, %v427_v38, %v429_v43  ;;  %v442_v45 = vsel %vm436_vm3, %v429_v43, %v431_v42 }
  0xe1   : > { %457 = vst [vmem:[#allocation2 + $0x1a8] sm:$0xf] %v441_v44  ;;  %458 = vst [vmem:[#allocation2 + $0x158] sm:$0xf] %v442_v45  ;;  %1464 = vrot.lane.b32.xlu1 %v2914_v8, %s2604_s21  ;;  %1462 = vrot.lane.b32.xlu0 %v2908_v61, %s2604_s21 }
  0xe3   : > { %v435_v46 = vpop.permute.xlu1 %434  ;;  %v433_v47 = vpop.permute.xlu0 %432 }
  0xe4   : > { %v443_v48 = vsel %vm436_vm3, %v431_v42, %v433_v47  ;;  %v444_v50 = vsel %vm436_vm3, %v433_v47, %v435_v46  ;;  %vm1184_vm3 = vcmask 48128  }
  0xe5   : > { %459 = vst [vmem:[#allocation2 + $0x2e0] sm:$0xf] %v443_v48  ;;  %460 = vst [vmem:[#allocation2 + $0x278] sm:$0xf] %v444_v50  ;;  %1518 = vrot.lane.b32.xlu1 %v2895_v55, %s2605_s23  ;;  %1466 = vrot.lane.b32.xlu0 %v2921_v9, %s2604_s21 }
  0xe7   : > { %v479_v51 = vpop.permute.xlu1 %478  ;;  %v477_v52 = vpop.permute.xlu0 %476 }
  0xe8   : > { %v495_v53 = vsel %vm494_vm4, %v477_v52, %v479_v51 }
  0xe9   : > { %511 = vst [vmem:[#allocation2 + $0x28] sm:$0xf0] %v495_v53  ;;  %1522 = vrot.lane.b32.xlu1 %v2908_v61, %s2605_s23  ;;  %1520 = vrot.lane.b32.xlu0 %v2948_v28, %s2605_s23 }
  0xeb   : > { %v483_v54 = vpop.permute.xlu1 %482  ;;  %v481_v56 = vpop.permute.xlu0 %480 }
  0xec   : > { %v496_v57 = vsel %vm494_vm4, %v479_v51, %v481_v56  ;;  %v497_v58 = vsel %vm494_vm4, %v481_v56, %v483_v54 }
  0xed   : > { %512 = vst [vmem:[#allocation2 + $0x330] sm:$0xf0] %v496_v57  ;;  %513 = vst [vmem:[#allocation2 + $0x2d0] sm:$0xf0] %v497_v58  ;;  %1458 = vrot.lane.b32.xlu1 %v2895_v55, %s2604_s21  ;;  %1524 = vrot.lane.b32.xlu0 %v2957_v32, %s2605_s23 }
  0xef   : > { %v487_v59 = vpop.permute.xlu1 %486  ;;  %v485_v62 = vpop.permute.xlu0 %484 }
  0xf0   : > { %v498_v63 = vsel %vm494_vm4, %v483_v54, %v485_v62  ;;  %v499_v6 = vsel %vm494_vm4, %v485_v62, %v487_v59 }
  0xf1   : > { %514 = vst [vmem:[#allocation2 + $0x198] sm:$0xf0] %v498_v63  ;;  %515 = vst [vmem:[#allocation2 + $0x1a8] sm:$0xf0] %v499_v6  ;;  %1345 = vrot.lane.b32.xlu1 %v2905_v60, %s2606_s28  ;;  %1516 = vrot.lane.b32.xlu0 %v2963_v37, %s2605_s23 }
  0xf3   : > { %v491_v7 = vpop.permute.xlu1 %490  ;;  %v489_v10 = vpop.permute.xlu0 %488 }
  0xf4   : > { %v500_v11 = vsel %vm494_vm4, %v487_v59, %v489_v10  ;;  %v501_v12 = vsel %vm494_vm4, %v489_v10, %v491_v7 }
  0xf5   : > { %516 = vst [vmem:[#allocation2 + $0x158] sm:$0xf0] %v500_v11  ;;  %517 = vst [vmem:[#allocation2 + $0x2e0] sm:$0xf0] %v501_v12  ;;  %1349 = vrot.lane.b32.xlu1 %v2914_v8, %s2606_s28  ;;  %1347 = vrot.lane.b32.xlu0 %v2908_v61, %s2606_s28 }
  0xf7   : > { %v534_v13 = vpop.permute.xlu1 %533  ;;  %v493_v14 = vpop.permute.xlu0 %492 }
  0xf8   : > { %v502_v15 = vsel %vm494_vm4, %v491_v7, %v493_v14  ;;  %vm1011_vm4 = vcmask 130048  }
  0xf9   : > { %518 = vst [vmem:[#allocation2 + $0x278] sm:$0xf0] %v502_v15  ;;  %1403 = vrot.lane.b32.xlu1 %v2895_v55, %s2607_s30  ;;  %1351 = vrot.lane.b32.xlu0 %v2921_v9, %s2606_s28 }
  0xfb   : > { %v538_v16 = vpop.permute.xlu1 %537  ;;  %v536_v20 = vpop.permute.xlu0 %535 }
  0xfc   : > { %v552_v21 = vsel %vm551_vm5, %v534_v13, %v536_v20  ;;  %v553_v22 = vsel %vm551_vm5, %v536_v20, %v538_v16  ;;  %v3100_v13 = vld [vmem:[%s2728_s29] sm:$0xff] }
  0xfd   : > { %568 = vst [vmem:[#allocation2 + $0x350] sm:$0xf] %v552_v21  ;;  %569 = vst [vmem:[#allocation2 + $0x120] sm:$0xf] %v553_v22  ;;  %1407 = vrot.lane.b32.xlu1 %v2908_v61, %s2607_s30  ;;  %1405 = vrot.lane.b32.xlu0 %v2948_v28, %s2607_s30 }
  0xff   : > { %v542_v23 = vpop.permute.xlu1 %541  ;;  %v540_v24 = vpop.permute.xlu0 %539 }
 0x100   : > { %v554_v25 = vsel %vm551_vm5, %v538_v16, %v540_v24  ;;  %v555_v26 = vsel %vm551_vm5, %v540_v24, %v542_v23 }
 0x101   : > { %570 = vst [vmem:[#allocation2 + $0x1a0] sm:$0xf] %v554_v25  ;;  %571 = vst [vmem:[#allocation2 + $0x260] sm:$0xf] %v555_v26  ;;  %1343 = vrot.lane.b32.xlu1 %v2895_v55, %s2606_s28  ;;  %1409 = vrot.lane.b32.xlu0 %v2957_v32, %s2607_s30 }
 0x103   : > { %v546_v27 = vpop.permute.xlu1 %545  ;;  %v544_v29 = vpop.permute.xlu0 %543 }
 0x104   : > { %v556_v30 = vsel %vm551_vm5, %v542_v23, %v544_v29  ;;  %v557_v31 = vsel %vm551_vm5, %v544_v29, %v546_v27  ;;  %v3133_v29 = vcombine.low %v3100_v13, %v3100_v13 }
 0x105   : > { %572 = vst [vmem:[#allocation2 + $0xe0] sm:$0xf] %v556_v30  ;;  %573 = vst [vmem:[#allocation2 + $0x130] sm:$0xf] %v557_v31  ;;  %1230 = vrot.lane.b32.xlu1 %v2905_v60, %s2608_s24  ;;  %1401 = vrot.lane.b32.xlu0 %v2963_v37, %s2607_s30  ;;  %v874_v30 = vcombine.high %v3100_v13, %v3100_v13 }
 0x107   : > { %v550_v33 = vpop.permute.xlu1 %549  ;;  %v548_v34 = vpop.permute.xlu0 %547 }
 0x108   : > { %v558_v35 = vsel %vm551_vm5, %v546_v27, %v548_v34  ;;  %v559_v36 = vsel %vm551_vm5, %v548_v34, %v550_v33  ;;  %vm1069_vm5 = vcmask 64512  }
 0x109   : > { %574 = vst [vmem:[#allocation2 + $0x1e8] sm:$0xf] %v558_v35  ;;  %575 = vst [vmem:[#allocation2 + $0x38] sm:$0xf] %v559_v36  ;;  %1234 = vrot.lane.b32.xlu1 %v2914_v8, %s2608_s24  ;;  %1232 = vrot.lane.b32.xlu0 %v2908_v61, %s2608_s24 }
 0x10b   : > { %v594_v38 = vpop.permute.xlu1 %593  ;;  %v592_v60 = vpop.permute.xlu0 %591 }
 0x10c   : > { %v610_v39 = vsel %vm609_vm6, %v592_v60, %v594_v38 }
 0x10d   : > { %626 = vst [vmem:[#allocation2 + $0x350] sm:$0xf0] %v610_v39  ;;  %1288 = vrot.lane.b32.xlu1 %v2895_v55, %s2609_s4  ;;  %1236 = vrot.lane.b32.xlu0 %v2921_v9, %s2608_s24 }
 0x10f   : > { %v598_v40 = vpop.permute.xlu1 %597  ;;  %v596_v41 = vpop.permute.xlu0 %595 }
 0x110   : > { %v611_v8 = vsel %vm609_vm6, %v594_v38, %v596_v41  ;;  %v612_v42 = vsel %vm609_vm6, %v596_v41, %v598_v40 }
 0x111   : > { %627 = vst [vmem:[#allocation2 + $0x120] sm:$0xf0] %v611_v8  ;;  %628 = vst [vmem:[#allocation2 + $0x1a0] sm:$0xf0] %v612_v42  ;;  %1292 = vrot.lane.b32.xlu1 %v2908_v61, %s2609_s4  ;;  %1290 = vrot.lane.b32.xlu0 %v2948_v28, %s2609_s4 }
 0x113   : > { %v602_v43 = vpop.permute.xlu1 %601  ;;  %v600_v44 = vpop.permute.xlu0 %599 }
 0x114   : > { %v613_v45 = vsel %vm609_vm6, %v598_v40, %v600_v44  ;;  %v614_v46 = vsel %vm609_vm6, %v600_v44, %v602_v43 }
 0x115   : > { %629 = vst [vmem:[#allocation2 + $0x260] sm:$0xf0] %v613_v45  ;;  %630 = vst [vmem:[#allocation2 + $0xe0] sm:$0xf0] %v614_v46  ;;  %1228 = vrot.lane.b32.xlu1 %v2895_v55, %s2608_s24  ;;  %1294 = vrot.lane.b32.xlu0 %v2957_v32, %s2609_s4 }
 0x117   : > { %v606_v47 = vpop.permute.xlu1 %605  ;;  %v604_v48 = vpop.permute.xlu0 %603 }
 0x118   : > { %v615_v61 = vsel %vm609_vm6, %v602_v43, %v604_v48  ;;  %v616_v28 = vsel %vm609_vm6, %v604_v48, %v606_v47 }
 0x119   : > { %631 = vst [vmem:[#allocation2 + $0x130] sm:$0xf0] %v615_v61  ;;  %632 = vst [vmem:[#allocation2 + $0x1e8] sm:$0xf0] %v616_v28  ;;  %1110 = vrot.lane.b32.xlu1 %v2785_v17, %s2610_s5  ;;  %1286 = vrot.lane.b32.xlu0 %v2963_v37, %s2609_s4 }
 0x11b   : > { %v649_v50 = vpop.permute.xlu1 %648  ;;  %v608_v55 = vpop.permute.xlu0 %607 }
 0x11c   : > { %v617_v51 = vsel %vm609_vm6, %v606_v47, %v608_v55  ;;  %vm3655_vm6 = vcmask 146432  }
 0x11d   : > { %633 = vst [vmem:[#allocation2 + $0x38] sm:$0xf0] %v617_v51  ;;  %1114 = vrot.lane.b32.xlu1 %v2791_v18, %s2610_s5  ;;  %1112 = vrot.lane.b32.xlu0 %v2735_v0, %s2610_s5 }
 0x11f   : > { %v653_v32 = vpop.permute.xlu1 %652  ;;  %v651_v52 = vpop.permute.xlu0 %650 }
 0x120   : > { %v667_v53 = vsel %vm666_vm7, %v649_v50, %v651_v52  ;;  %v668_v54 = vsel %vm666_vm7, %v651_v52, %v653_v32 }
 0x121   : > { %683 = vst [vmem:[#allocation2 + $0xd8] sm:$0xf] %v667_v53  ;;  %684 = vst [vmem:[#allocation2 + $0x298] sm:$0xf] %v668_v54  ;;  %1168 = vrot.lane.b32.xlu1 %v2738_v1, %s2611_s6  ;;  %1116 = vrot.lane.b32.xlu0 %v2749_v3, %s2610_s5 }
 0x123   : > { %v657_v37 = vpop.permute.xlu1 %656  ;;  %v655_v56 = vpop.permute.xlu0 %654 }
 0x124   : > { %v669_v57 = vsel %vm666_vm7, %v653_v32, %v655_v56  ;;  %v670_v58 = vsel %vm666_vm7, %v655_v56, %v657_v37 }
 0x125   : > { %685 = vst [vmem:[#allocation2 + $0xb8] sm:$0xf] %v669_v57  ;;  %686 = vst [vmem:[#allocation2 + $0x170] sm:$0xf] %v670_v58  ;;  %1172 = vrot.lane.b32.xlu1 %v2735_v0, %s2611_s6  ;;  %1170 = vrot.lane.b32.xlu0 %v2753_v4, %s2611_s6 }
 0x127   : > { %v661_v59 = vpop.permute.xlu1 %660  ;;  %v659_v62 = vpop.permute.xlu0 %658 }
 0x128   : > { %v671_v63 = vsel %vm666_vm7, %v657_v37, %v659_v62  ;;  %v672_v3 = vsel %vm666_vm7, %v659_v62, %v661_v59 }
 0x129   : > { %687 = vst [vmem:[#allocation2 + $0x98] sm:$0xf] %v671_v63  ;;  %688 = vst [vmem:[#allocation2 + $0xa0] sm:$0xf] %v672_v3  ;;  %1108 = vrot.lane.b32.xlu1 %v2738_v1, %s2610_s5  ;;  %1174 = vrot.lane.b32.xlu0 %v2757_v5, %s2611_s6 }
 0x12b   : > { %v665_v6 = vpop.permute.xlu1 %664  ;;  %v663_v7 = vpop.permute.xlu0 %662 }
 0x12c   : > { %v673_v10 = vsel %vm666_vm7, %v661_v59, %v663_v7  ;;  %v674_v4 = vsel %vm666_vm7, %v663_v7, %v665_v6  ;;  %vm3656_vm7 = vcmask 138240  }
 0x12d   : > { %689 = vst [vmem:[#allocation2 + $0x320] sm:$0xf] %v673_v10  ;;  %690 = vst [vmem:[#allocation2 + $0xf0] sm:$0xf] %v674_v4  ;;  %995 = vrot.lane.b32.xlu1 %v2785_v17, %s3651_s7  ;;  %1166 = vrot.lane.b32.xlu0 %v2746_v2, %s2611_s6  ;;  %v3103_v17 = vld [vmem:[%s2728_s29 + $0x10] sm:$0xff]  ;;  %v3106_v2 = vld [vmem:[%s2728_s29 + $0x8] sm:$0xff] }
 0x12e   : > { %v3128_v23 = vcombine.low %v3103_v17, %v3103_v17 }
 0x12f   : > { %v3091_v5 = vpop.permute.xlu1 %708  ;;  %v707_v11 = vpop.permute.xlu0 %706 }
 0x130   : > { %v725_v12 = vsel %vm724_vm8, %v707_v11, %v3091_v5 }
 0x131   : > { %741 = vst [vmem:[#allocation2 + $0xd8] sm:$0xf0] %v725_v12  ;;  %999 = vrot.lane.b32.xlu1 %v2791_v18, %s3651_s7  ;;  %997 = vrot.lane.b32.xlu0 %v2735_v0, %s3651_s7  ;;  %v3115_v0 = vcombine.low %v3106_v2, %v3106_v2 }
 0x133   : > { %v1693_v14 = vpop.permute.xlu1 %1692  ;;  %v1691_v15 = vpop.permute.xlu0 %1690 }
 0x134   : > { %v1708_v16 = vsel %vm1706_vm9, %v1691_v15, %v1693_v14 }
 0x135   : > { %1724 = vst [vmem:[#allocation2 + $0x220] sm:$0xf] %v1708_v16  ;;  %1053 = vrot.lane.b32.xlu1 %v3100_v13, %s3649_s8  ;;  %1001 = vrot.lane.b32.xlu0 %v3103_v17, %s3651_s7 }
 0x137   : > { %v3117_v18 = vpop.permute.xlu1 %1696  ;;  %v1695_v20 = vpop.permute.xlu0 %1694 }
 0x138   : > { %v1709_v21 = vsel %vm1706_vm9, %v1693_v14, %v1695_v20  ;;  %v1710_v22 = vsel %vm1706_vm9, %v1695_v20, %v3117_v18 }
 0x139   : > { %1725 = vst [vmem:[#allocation2 + $0x8] sm:$0xf] %v1709_v21  ;;  %1726 = vst [vmem:[#allocation2 + $0x18] sm:$0xf] %v1710_v22  ;;  %1057 = vrot.lane.b32.xlu1 %v3106_v2, %s3649_s8  ;;  %1055 = vrot.lane.b32.xlu0 %v3115_v0, %s3649_s8 }
 0x13b   : > { %v1576_v24 = vpop.permute.xlu1 %1575  ;;  %v1689_v25 = vpop.permute.xlu0 %1688 }
 0x13c   : > { %v1707_v26 = vsel %vm1706_vm9, %v1689_v25, %v1691_v15  ;;  %v1845_v27 = vld [vmem:[#allocation2 + $0x220] sm:$0xff] }
 0x13d   : > { %1723 = vst [vmem:[#allocation2 + $0x190] sm:$0xf] %v1707_v26  ;;  %993 = vrot.lane.b32.xlu1 %v2738_v1, %s3651_s7  ;;  %1059 = vrot.lane.b32.xlu0 %v3128_v23, %s3649_s8  ;;  %v875_v1 = vcombine.high %v3106_v2, %v3106_v2  ;;  %s2616_s7 = smov 27  }
 0x13e   : > { %1866 = vmatprep.subr.mxu0 %v1845_v27 }
 0x13f   : > { %v1580_v31 = vpop.permute.xlu1 %1579  ;;  %v1578_v33 = vpop.permute.xlu0 %1577 }
 0x140   : > { %v1593_v34 = vsel %vm1591_vm10, %v1576_v24, %v1578_v33  ;;  %v1594_v35 = vsel %vm1591_vm10, %v1578_v33, %v1580_v31  ;;  %v1847_v36 = vld [vmem:[#allocation2 + $0x18] sm:$0xff]  ;;  %v1846_v38 = vld [vmem:[#allocation2 + $0x8] sm:$0xff]  ;;  %v3219_v33 = vcombine.high %v2921_v9, %v2921_v9 }
 0x141   : > { %1609 = vst [vmem:[#allocation2 + $0x258] sm:$0xf] %v1593_v34  ;;  %1610 = vst [vmem:[#allocation2 + $0x1b8] sm:$0xf] %v1594_v35  ;;  %880 = vrot.lane.b32.xlu1 %v874_v30, %s2614_s9  ;;  %1051 = vrot.lane.b32.xlu0 %v3133_v29, %s3649_s8  ;;  %s3653_s8 = smov 17  }
 0x142   : > { %1937 = vmatprep.subr.mxu1 %v1847_v36 }
 0x143   : > { %1938 = vmatpush1.msra.mxu1 %v1846_v38  ;;  %v1634_v60 = vpop.permute.xlu1 %1633  ;;  %v3148_v39 = vpop.permute.xlu0 %1581 }
 0x144   : > { %v1595_v40 = vsel %vm1591_vm10, %v1580_v31, %v3148_v39  ;;  %v1844_v41 = vld [vmem:[#allocation2 + $0x190] sm:$0xff] }
 0x145   : > { %1611 = vst [vmem:[#allocation2 + $0x118] sm:$0xf] %v1595_v40  ;;  %884 = vrot.lane.b32.xlu1 %v875_v1, %s2614_s9  ;;  %882 = vrot.lane.b32.xlu0 %v3106_v2, %s2614_s9 }
 0x146   : > { %1867 = vmatpush1.msra.mxu0 %v1844_v41 }
 0x147   : > { %v1638_v8 = vpop.permute.xlu1 %1637  ;;  %v1636_v42 = vpop.permute.xlu0 %1635 }
 0x148   : > { %v1651_v43 = vsel %vm1649_vm11, %v1634_v60, %v1636_v42  ;;  %v1652_v44 = vsel %vm1649_vm11, %v1636_v42, %v1638_v8 }
 0x149   : > { %1667 = vst [vmem:[#allocation2 + $0x258] sm:$0xf0] %v1651_v43  ;;  %1668 = vst [vmem:[#allocation2 + $0x1b8] sm:$0xf0] %v1652_v44  ;;  %938 = vrot.lane.b32.xlu1 %v3100_v13, %s3653_s8  ;;  %886 = vrot.lane.b32.xlu0 %v3103_v17, %s2614_s9  ;;  %v2321_v44 = vld [vmem:[%s2728_s29 + $0x24] sm:$0xf] }
 0x14b   : > { %v1574_v45 = vpop.permute.xlu1 %1573  ;;  %v3161_v46 = vpop.permute.xlu0 %1639 }
 0x14c   : > { %v1592_v47 = vsel %vm1591_vm10, %v1574_v45, %v1576_v24  ;;  %v1653_v48 = vsel %vm1649_vm11, %v1638_v8, %v3161_v46 }
 0x14d   : > { %1608 = vst [vmem:[#allocation2 + $0x240] sm:$0xf] %v1592_v47  ;;  %1669 = vst [vmem:[#allocation2 + $0x118] sm:$0xf0] %v1653_v48  ;;  %942 = vrot.lane.b32.xlu1 %v3106_v2, %s3653_s8  ;;  %940 = vrot.lane.b32.xlu0 %v3115_v0, %s3653_s8 }
 0x14f   : > { %v1461_v61 = vpop.permute.xlu1 %1460  ;;  %v1632_v28 = vpop.permute.xlu0 %1631 }
 0x150   : > { %v1650_v50 = vsel %vm1649_vm11, %v1632_v28, %v1634_v60  ;;  %v1837_v55 = vld [vmem:[#allocation2 + $0x258] sm:$0xff] }
 0x151   : > { %1666 = vst [vmem:[#allocation2 + $0x240] sm:$0xf0] %v1650_v50  ;;  %878 = vrot.lane.b32.xlu1 %v3100_v13, %s2614_s9  ;;  %944 = vrot.lane.b32.xlu0 %v3128_v23, %s3653_s8  ;;  %v1838_v37 = vld [vmem:[#allocation2 + $0x1b8] sm:$0xff] }
 0x152   : > { %1868 = vmatprep.subr.mxu0 %v1837_v55 }
 0x153   : > { %v1465_v51 = vpop.permute.xlu1 %1464  ;;  %v1463_v32 = vpop.permute.xlu0 %1462 }
 0x154   : > { %v1478_v52 = vsel %vm1476_vm12, %v1461_v61, %v1463_v32  ;;  %v1479_v53 = vsel %vm1476_vm12, %v1463_v32, %v1465_v51  ;;  %v1839_v54 = vld [vmem:[#allocation2 + $0x118] sm:$0xff] }
 0x155   : > { %1494 = vst [vmem:[#allocation2 + $0x168] sm:$0xf] %v1478_v52  ;;  %1495 = vst [vmem:[#allocation2 + $0x288] sm:$0xf] %v1479_v53  ;;  %765 = vrot.lane.b32.xlu1 %v874_v30, %s2616_s7  ;;  %936 = vrot.lane.b32.xlu0 %v3133_v29, %s3653_s8  ;;  %s2617_s8 = smov 26  }
 0x156   : > { %1939 = vmatprep.subr.mxu1 %v1839_v54  ;;  %v2462_v54 = vld [vmem:[%s2728_s29 + $0x24] ss:$0 sps:$4 sm:$0xff]  }
 0x157   : > { %1940 = vmatpush1.msra.mxu1 %v1838_v37  ;;  %v1519_v56 = vpop.permute.xlu1 %1518  ;;  %v3180_v57 = vpop.permute.xlu0 %1466 }
 0x158   : > { %v1480_v58 = vsel %vm1476_vm12, %v1465_v51, %v3180_v57  ;;  %v1836_v59 = vld [vmem:[#allocation2 + $0x240] sm:$0xff] }
 0x159   : > { %1496 = vst [vmem:[#allocation2 + $0x1d0] sm:$0xf] %v1480_v58  ;;  %769 = vrot.lane.b32.xlu1 %v875_v1, %s2616_s7  ;;  %767 = vrot.lane.b32.xlu0 %v3106_v2, %s2616_s7 }
 0x15a   : > { %1869 = vmatpush1.msra.mxu0 %v1836_v59 }
 0x15b   : > { %v1523_v62 = vpop.permute.xlu1 %1522  ;;  %v1521_v63 = vpop.permute.xlu0 %1520 }
 0x15c   : > { %v1536_v3 = vsel %vm1534_vm13, %v1519_v56, %v1521_v63  ;;  %v1537_v6 = vsel %vm1534_vm13, %v1521_v63, %v1523_v62 }
 0x15d   : > { %1552 = vst [vmem:[#allocation2 + $0x168] sm:$0xf0] %v1536_v3  ;;  %1553 = vst [vmem:[#allocation2 + $0x288] sm:$0xf0] %v1537_v6  ;;  %823 = vrot.lane.b32.xlu1 %v3100_v13, %s2617_s8  ;;  %771 = vrot.lane.b32.xlu0 %v3103_v17, %s2616_s7 }
 0x15f   : > { %v1459_v7 = vpop.permute.xlu1 %1458  ;;  %v3193_v10 = vpop.permute.xlu0 %1524 }
 0x160   : > { %v1477_v4 = vsel %vm1476_vm12, %v1459_v7, %v1461_v61  ;;  %v1538_v11 = vsel %vm1534_vm13, %v1523_v62, %v3193_v10  ;;  %v2311_v7 = vld [vmem:[%s2728_s29 + $0x24] sm:$0xf] }
 0x161   : > { %1493 = vst [vmem:[#allocation2 + $0x348] sm:$0xf] %v1477_v4  ;;  %1554 = vst [vmem:[#allocation2 + $0x1d0] sm:$0xf0] %v1538_v11  ;;  %827 = vrot.lane.b32.xlu1 %v3106_v2, %s2617_s8  ;;  %825 = vrot.lane.b32.xlu0 %v3115_v0, %s2617_s8 }
 0x163   : > { %v1346_v12 = vpop.permute.xlu1 %1345  ;;  %v1517_v14 = vpop.permute.xlu0 %1516 }
 0x164   : > { %v1535_v15 = vsel %vm1534_vm13, %v1517_v14, %v1519_v56  ;;  %v1829_v16 = vld [vmem:[#allocation2 + $0x168] sm:$0xff] }
 0x165   : > { %1551 = vst [vmem:[#allocation2 + $0x348] sm:$0xf0] %v1535_v15  ;;  %763 = vrot.lane.b32.xlu1 %v3100_v13, %s2616_s7  ;;  %829 = vrot.lane.b32.xlu0 %v3128_v23, %s2617_s8  ;;  %v1830_v13 = vld [vmem:[#allocation2 + $0x288] sm:$0xff] }
 0x166   : > { %1870 = vmatprep.subr.mxu0 %v1829_v16 }
 0x167   : > { %v1350_v20 = vpop.permute.xlu1 %1349  ;;  %v1348_v21 = vpop.permute.xlu0 %1347 }
 0x168   : > { %v1363_v22 = vsel %vm1361_vm14, %v1346_v12, %v1348_v21  ;;  %v1364_v24 = vsel %vm1361_vm14, %v1348_v21, %v1350_v20  ;;  %v1831_v25 = vld [vmem:[#allocation2 + $0x1d0] sm:$0xff] }
 0x169   : > { %1379 = vst [vmem:[#allocation2 + $0x20] sm:$0xf] %v1363_v22  ;;  %1380 = vst [vmem:[#allocation2 + $0x68] sm:$0xf] %v1364_v24  ;;  %710 = vrot.lane.b32.xlu1 %v3115_v0, %s2600_s10  ;;  %821 = vrot.lane.b32.xlu0 %v3133_v29, %s2617_s8  ;;  %v3226_v0 = vld [vmem:[%s2728_s29 + $0x1c] sm:$0xff] }
 0x16a   : > { %1941 = vmatprep.subr.mxu1 %v1831_v25  ;;  %v3232_v38 = vcombine.high %v3226_v0, %v3226_v0  ;;  %v3260_v50 = vcombine.low %v3226_v0, %v3226_v0  ;;  %v2463_v24 = vld [vmem:[%s2728_s29 + $0x24] ss:$0 sps:$4 sm:$0xff]  }
 0x16b   : > { %1942 = vmatpush1.msra.mxu1 %v1830_v13  ;;  %v1404_v26 = vpop.permute.xlu1 %1403  ;;  %v3213_v27 = vpop.permute.xlu0 %1351 }
 0x16c   : > { %v1365_v30 = vsel %vm1361_vm14, %v1350_v20, %v3213_v27  ;;  %v1828_v31 = vld [vmem:[#allocation2 + $0x348] sm:$0xff] }
 0x16d   : > { %1381 = vst [vmem:[#allocation2 + $0x78] sm:$0xf] %v1365_v30  ;;  %714 = vrot.lane.b32.xlu1 %v3128_v23, %s2600_s10  ;;  %712 = vrot.lane.b32.xlu0 %v3106_v2, %s2600_s10  ;;  %v2331_v2 = vld [vmem:[%s2728_s29 + $0x24] sm:$0xf] }
 0x16e   : > { %1871 = vmatpush1.msra.mxu0 %v1828_v31 }
 0x16f   : > { %v1408_v29 = vpop.permute.xlu1 %1407  ;;  %v1406_v34 = vpop.permute.xlu0 %1405 }
 0x170   : > { %v1421_v35 = vsel %vm1419_vm15, %v1404_v26, %v1406_v34  ;;  %v1422_v36 = vsel %vm1419_vm15, %v1406_v34, %v1408_v29 }
 0x171   : > { %1437 = vst [vmem:[#allocation2 + $0x20] sm:$0xf0] %v1421_v35  ;;  %1438 = vst [vmem:[#allocation2 + $0x68] sm:$0xf0] %v1422_v36  ;;  %1700 = vrot.lane.b32.xlu1 %v3226_v0, %s2601_s11  ;;  %1698 = vrot.lane.b32.xlu0 %v3219_v33, %s2601_s11 }
 0x173   : > { %v1344_v23 = vpop.permute.xlu1 %1343  ;;  %v3239_v1 = vpop.permute.xlu0 %1409 }
 0x174   : > { %v1362_v60 = vsel %vm1361_vm14, %v1344_v23, %v1346_v12  ;;  %v1423_v40 = vsel %vm1419_vm15, %v1408_v29, %v3239_v1 }
 0x175   : > { %1378 = vst [vmem:[#allocation2 + $0x140] sm:$0xf] %v1362_v60  ;;  %1439 = vst [vmem:[#allocation2 + $0x78] sm:$0xf0] %v1423_v40  ;;  %1704 = vrot.lane.b32.xlu1 %v2331_v2, %s2601_s11  ;;  %1702 = vrot.lane.b32.xlu0 %v3232_v38, %s2601_s11  ;;  %v2301_v2 = vld [vmem:[%s2728_s29 + $0x24] sm:$0xf] }
 0x176   : > { %s3662_s11 = smov 16  }
 0x177   : > { %v1231_v41 = vpop.permute.xlu1 %1230  ;;  %v1402_v8 = vpop.permute.xlu0 %1401 }
 0x178   : > { %v1420_v42 = vsel %vm1419_vm15, %v1402_v8, %v1404_v26  ;;  %v1821_v43 = vld [vmem:[#allocation2 + $0x20] sm:$0xff]  ;;  %v1822_v55 = vld [vmem:[#allocation2 + $0x68] sm:$0xff] }
 0x179   : > { %1436 = vst [vmem:[#allocation2 + $0x140] sm:$0xf0] %v1420_v42  ;;  %1585 = vrot.lane.b32.xlu1 %v3226_v0, %s2602_s18  ;;  %1583 = vrot.lane.b32.xlu0 %v3219_v33, %s2602_s18 }
 0x17a   : > { %1872 = vmatprep.subr.mxu0 %v1821_v43 }
 0x17b   : > { %v1235_v45 = vpop.permute.xlu1 %1234  ;;  %v1233_v47 = vpop.permute.xlu0 %1232 }
 0x17c   : > { %v1248_v48 = vsel %vm1246_vm0, %v1231_v41, %v1233_v47  ;;  %v1249_v61 = vsel %vm1246_vm0, %v1233_v47, %v1235_v45  ;;  %v1823_v28 = vld [vmem:[#allocation2 + $0x78] sm:$0xff] }
 0x17d   : > { %1264 = vst [vmem:[#allocation2 + $0x210] sm:$0xf] %v1248_v48  ;;  %1265 = vst [vmem:[#allocation2 + $0x1e0] sm:$0xf] %v1249_v61  ;;  %1589 = vrot.lane.b32.xlu1 %v2321_v44, %s2602_s18  ;;  %1587 = vrot.lane.b32.xlu0 %v3232_v38, %s2602_s18  ;;  %s3663_s18 = smov 8  }
 0x17e   : > { %1943 = vmatprep.subr.mxu1 %v1823_v28 }
 0x17f   : > { %1944 = vmatpush1.msra.mxu1 %v1822_v55  ;;  %v1289_v51 = vpop.permute.xlu1 %1288  ;;  %v3262_v32 = vpop.permute.xlu0 %1236 }
 0x180   : > { %v1250_v52 = vsel %vm1246_vm0, %v1235_v45, %v3262_v32  ;;  %v1820_v53 = vld [vmem:[#allocation2 + $0x140] sm:$0xff] }
 0x181   : > { %1266 = vst [vmem:[#allocation2 + $0x50] sm:$0xf] %v1250_v52  ;;  %1643 = vrot.lane.b32.xlu1 %v3260_v50, %s2603_s19  ;;  %1641 = vrot.lane.b32.xlu0 %v2921_v9, %s2603_s19  ;;  %v2464_v45 = vld [vmem:[%s2728_s29 + $0x24] ss:$0 sps:$4 sm:$0xff]  }
 0x182   : > { %1873 = vmatpush1.msra.mxu0 %v1820_v53 }
 0x183   : > { %v1293_v37 = vpop.permute.xlu1 %1292  ;;  %v1291_v56 = vpop.permute.xlu0 %1290 }
 0x184   : > { %v1306_v58 = vsel %vm1304_vm1, %v1289_v51, %v1291_v56  ;;  %v1307_v59 = vsel %vm1304_vm1, %v1291_v56, %v1293_v37 }
 0x185   : > { %1322 = vst [vmem:[#allocation2 + $0x210] sm:$0xf0] %v1306_v58  ;;  %1323 = vst [vmem:[#allocation2 + $0x1e0] sm:$0xf0] %v1307_v59  ;;  %1647 = vrot.lane.b32.xlu1 %v2462_v54, %s2603_s19  ;;  %1645 = vrot.lane.b32.xlu0 %v3226_v0, %s2603_s19  ;;  %s3664_s19 = smov 17  }
 0x187   : > { %v1229_v62 = vpop.permute.xlu1 %1228  ;;  %v3276_v63 = vpop.permute.xlu0 %1294 }
 0x188   : > { %v1247_v3 = vsel %vm1246_vm0, %v1229_v62, %v1231_v41  ;;  %v1308_v6 = vsel %vm1304_vm1, %v1293_v37, %v3276_v63  ;;  %v2291_v37 = vld [vmem:[%s2728_s29 + $0x24] sm:$0xf] }
 0x189   : > { %1263 = vst [vmem:[#allocation2 + $0x30] sm:$0xf] %v1247_v3  ;;  %1324 = vst [vmem:[#allocation2 + $0x50] sm:$0xf0] %v1308_v6  ;;  %1470 = vrot.lane.b32.xlu1 %v3226_v0, %s2604_s21  ;;  %1468 = vrot.lane.b32.xlu0 %v3219_v33, %s2604_s21 }
 0x18b   : > { %v1111_v4 = vpop.permute.xlu1 %1110  ;;  %v1287_v11 = vpop.permute.xlu0 %1286 }
 0x18c   : > { %v1305_v12 = vsel %vm1304_vm1, %v1287_v11, %v1289_v51  ;;  %v1813_v14 = vld [vmem:[#allocation2 + $0x210] sm:$0xff]  ;;  %v1814_v25 = vld [vmem:[#allocation2 + $0x1e0] sm:$0xff] }
 0x18d   : > { %1321 = vst [vmem:[#allocation2 + $0x30] sm:$0xf0] %v1305_v12  ;;  %1474 = vrot.lane.b32.xlu1 %v2311_v7, %s2604_s21  ;;  %1472 = vrot.lane.b32.xlu0 %v3232_v38, %s2604_s21  ;;  %v2465_v11 = vld [vmem:[%s2728_s29 + $0x24] ss:$0 sps:$4 sm:$0xff]  }
 0x18e   : > { %1874 = vmatprep.subr.mxu0 %v1813_v14 }
 0x18f   : > { %v1115_v15 = vpop.permute.xlu1 %1114  ;;  %v1113_v16 = vpop.permute.xlu0 %1112 }
 0x190   : > { %v1128_v20 = vsel %vm1126_vm2, %v1111_v4, %v1113_v16  ;;  %v1129_v21 = vsel %vm1126_vm2, %v1113_v16, %v1115_v15  ;;  %v1815_v22 = vld [vmem:[#allocation2 + $0x50] sm:$0xff]  ;;  %v3359_v16 = vld [vmem:[%s2728_s29 + $0x18] sm:$0xff] }
 0x191   : > { %1144 = vst [vmem:[#allocation2 + $0x370] sm:$0xf] %v1128_v20  ;;  %1145 = vst [vmem:[#allocation2 + $0xa8] sm:$0xf] %v1129_v21  ;;  %1528 = vrot.lane.b32.xlu1 %v3260_v50, %s2605_s23  ;;  %1526 = vrot.lane.b32.xlu0 %v2921_v9, %s2605_s23 }
 0x192   : > { %1945 = vmatprep.subr.mxu1 %v1815_v22 }
 0x193   : > { %1946 = vmatpush1.msra.mxu1 %v1814_v25  ;;  %v1169_v13 = vpop.permute.xlu1 %1168  ;;  %v3297_v26 = vpop.permute.xlu0 %1116  ;;  %v3365_v25 = vcombine.high %v3359_v16, %v3359_v16 }
 0x194   : > { %v1130_v30 = vsel %vm1126_vm2, %v1115_v15, %v3297_v26  ;;  %v1812_v31 = vld [vmem:[#allocation2 + $0x30] sm:$0xff] }
 0x195   : > { %1146 = vst [vmem:[#allocation2 + $0xc8] sm:$0xf] %v1130_v30  ;;  %1532 = vrot.lane.b32.xlu1 %v2463_v24, %s2605_s23  ;;  %1530 = vrot.lane.b32.xlu0 %v3226_v0, %s2605_s23 }
 0x196   : > { %1875 = vmatpush1.msra.mxu0 %v1812_v31 }
 0x197   : > { %v1173_v29 = vpop.permute.xlu1 %1172  ;;  %v1171_v34 = vpop.permute.xlu0 %1170 }
 0x198   : > { %v1186_v35 = vsel %vm1184_vm3, %v1169_v13, %v1171_v34  ;;  %v1187_v36 = vsel %vm1184_vm3, %v1171_v34, %v1173_v29 }
 0x199   : > { %1202 = vst [vmem:[#allocation2 + $0x370] sm:$0xf0] %v1186_v35  ;;  %1203 = vst [vmem:[#allocation2 + $0xa8] sm:$0xf0] %v1187_v36  ;;  %1355 = vrot.lane.b32.xlu1 %v3226_v0, %s2606_s28  ;;  %1353 = vrot.lane.b32.xlu0 %v3219_v33, %s2606_s28 }
 0x19b   : > { %v1109_v23 = vpop.permute.xlu1 %1108  ;;  %v3311_v60 = vpop.permute.xlu0 %1174 }
 0x19c   : > { %v1127_v40 = vsel %vm1126_vm2, %v1109_v23, %v1111_v4  ;;  %v1188_v41 = vsel %vm1184_vm3, %v1173_v29, %v3311_v60  ;;  %v2477_v4 = vld [vmem:[%s2728_s29 + $0x14] sm:$0xff] }
 0x19d   : > { %1143 = vst [vmem:[#allocation2 + $0x218] sm:$0xf] %v1127_v40  ;;  %1204 = vst [vmem:[#allocation2 + $0xc8] sm:$0xf0] %v1188_v41  ;;  %1359 = vrot.lane.b32.xlu1 %v2301_v2, %s2606_s28  ;;  %1357 = vrot.lane.b32.xlu0 %v3232_v38, %s2606_s28  ;;  %v2478_v40 = vld [vmem:[%s2728_s29 + $0x10] sm:$0xff] }
 0x19e   : > { %v2468_v41 = vld [vmem:[%s2728_s29 + $0x20] ss:$0 sps:$4 sm:$0xff]  }
 0x19f   : > { %v996_v8 = vpop.permute.xlu1 %995  ;;  %v1167_v42 = vpop.permute.xlu0 %1166 }
 0x1a0   : > { %v1185_v43 = vsel %vm1184_vm3, %v1167_v42, %v1169_v13  ;;  %v1805_v44 = vld [vmem:[#allocation2 + $0x370] sm:$0xff]  ;;  %v1098_v13 = vld [vmem:[%s2728_s29 + $0x20] sm:$0xf] }
 0x1a1   : > { %1201 = vst [vmem:[#allocation2 + $0x218] sm:$0xf0] %v1185_v43  ;;  %1413 = vrot.lane.b32.xlu1 %v3260_v50, %s2607_s30  ;;  %1411 = vrot.lane.b32.xlu0 %v2921_v9, %s2607_s30  ;;  %v1806_v9 = vld [vmem:[#allocation2 + $0xa8] sm:$0xff] }
 0x1a2   : > { %1876 = vmatprep.subr.mxu0 %v1805_v44 }
 0x1a3   : > { %v1000_v47 = vpop.permute.xlu1 %999  ;;  %v998_v48 = vpop.permute.xlu0 %997 }
 0x1a4   : > { %v1013_v61 = vsel %vm1011_vm4, %v996_v8, %v998_v48  ;;  %v1014_v28 = vsel %vm1011_vm4, %v998_v48, %v1000_v47  ;;  %v1807_v55 = vld [vmem:[#allocation2 + $0xc8] sm:$0xff] }
 0x1a5   : > { %1029 = vst [vmem:[#allocation2 + $0xf8] sm:$0xf] %v1013_v61  ;;  %1030 = vst [vmem:[#allocation2 + $0x1c8] sm:$0xf] %v1014_v28  ;;  %1417 = vrot.lane.b32.xlu1 %v2464_v45, %s2607_s30  ;;  %1415 = vrot.lane.b32.xlu0 %v3226_v0, %s2607_s30  ;;  %v3397_v45 = vcombine.high %v3103_v17, %v3103_v17 }
 0x1a6   : > { %1947 = vmatprep.subr.mxu1 %v1807_v55  ;;  %v983_v55 = vld [vmem:[%s2728_s29 + $0x20] sm:$0xf] }
 0x1a7   : > { %1948 = vmatpush1.msra.mxu1 %v1806_v9  ;;  %v1054_v51 = vpop.permute.xlu1 %1053  ;;  %v3330_v52 = vpop.permute.xlu0 %1001 }
 0x1a8   : > { %v1015_v53 = vsel %vm1011_vm4, %v1000_v47, %v3330_v52  ;;  %v1804_v54 = vld [vmem:[#allocation2 + $0x218] sm:$0xff] }
 0x1a9   : > { %1031 = vst [vmem:[#allocation2 + $0xb0] sm:$0xf] %v1015_v53  ;;  %1240 = vrot.lane.b32.xlu1 %v3226_v0, %s2608_s24  ;;  %1238 = vrot.lane.b32.xlu0 %v3219_v33, %s2608_s24 }
 0x1aa   : > { %1877 = vmatpush1.msra.mxu0 %v1804_v54 }
 0x1ab   : > { %v1058_v56 = vpop.permute.xlu1 %1057  ;;  %v1056_v58 = vpop.permute.xlu0 %1055 }
 0x1ac   : > { %v1071_v59 = vsel %vm1069_vm5, %v1054_v51, %v1056_v58  ;;  %v1072_v62 = vsel %vm1069_vm5, %v1056_v58, %v1058_v56 }
 0x1ad   : > { %1087 = vst [vmem:[#allocation2 + $0xf8] sm:$0xf0] %v1071_v59  ;;  %1088 = vst [vmem:[#allocation2 + $0x1c8] sm:$0xf0] %v1072_v62  ;;  %1244 = vrot.lane.b32.xlu1 %v2291_v37, %s2608_s24  ;;  %1242 = vrot.lane.b32.xlu0 %v3232_v38, %s2608_s24  ;;  %s2341_s24 = sshll.u32 %s2580_s15, 10  ;;  %s2619_s15 = smov [#allocation6]  }
 0x1af   : > { %v994_v3 = vpop.permute.xlu1 %993  ;;  %v3344_v33 = vpop.permute.xlu0 %1059 }
 0x1b0   : > { %v1012_v6 = vsel %vm1011_vm4, %v994_v3, %v996_v8  ;;  %v1073_v7 = vsel %vm1069_vm5, %v1058_v56, %v3344_v33 }
 0x1b1   : > { %1028 = vst [vmem:[#allocation2 + $0x270] sm:$0xf] %v1012_v6  ;;  %1089 = vst [vmem:[#allocation2 + $0xb0] sm:$0xf0] %v1073_v7  ;;  %1298 = vrot.lane.b32.xlu1 %v3260_v50, %s2609_s4  ;;  %1296 = vrot.lane.b32.xlu0 %v2477_v4, %s2609_s4  ;;  %v2469_v6 = vld [vmem:[%s2728_s29 + $0x20] ss:$0 sps:$4 sm:$0xff]  }
 0x1b3   : > { %v881_v12 = vpop.permute.xlu1 %880  ;;  %v1052_v38 = vpop.permute.xlu0 %1051 }
 0x1b4   : > { %v1070_v14 = vsel %vm1069_vm5, %v1052_v38, %v1054_v51  ;;  %v1797_v15 = vld [vmem:[#allocation2 + $0xf8] sm:$0xff] }
 0x1b5   : > { %1086 = vst [vmem:[#allocation2 + $0x270] sm:$0xf0] %v1070_v14  ;;  %1302 = vrot.lane.b32.xlu1 %v2465_v11, %s2609_s4  ;;  %1300 = vrot.lane.b32.xlu0 %v3226_v0, %s2609_s4  ;;  %v1798_v0 = vld [vmem:[#allocation2 + $0x1c8] sm:$0xff] }
 0x1b6   : > { %1878 = vmatprep.subr.mxu0 %v1797_v15 }
 0x1b7   : > { %v885_v50 = vpop.permute.xlu1 %884  ;;  %v883_v20 = vpop.permute.xlu0 %882 }
 0x1b8   : > { %v898_v21 = vsel %vm3655_vm6, %v881_v12, %v883_v20  ;;  %v899_v22 = vsel %vm3655_vm6, %v883_v20, %v885_v50  ;;  %v1799_v24 = vld [vmem:[#allocation2 + $0xb0] sm:$0xff]  ;;  %v868_v20 = vld [vmem:[%s2728_s29 + $0x20] sm:$0xf] }
 0x1b9   : > { %914 = vst [vmem:[#allocation2 + $0x228] sm:$0xf] %v898_v21  ;;  %915 = vst [vmem:[#allocation2 + $0x178] sm:$0xf] %v899_v22  ;;  %1120 = vrot.lane.b32.xlu1 %v3359_v16, %s2610_s5  ;;  %1118 = vrot.lane.b32.xlu0 %v2797_v19, %s2610_s5  ;;  %v3381_v19 = vcombine.low %v3359_v16, %v3359_v16 }
 0x1ba   : > { %1949 = vmatprep.subr.mxu1 %v1799_v24 }
 0x1bb   : > { %1950 = vmatpush1.msra.mxu1 %v1798_v0  ;;  %v939_v30 = vpop.permute.xlu1 %938  ;;  %v3372_v31 = vpop.permute.xlu0 %886 }
 0x1bc   : > { %v900_v29 = vsel %vm3655_vm6, %v885_v50, %v3372_v31  ;;  %v1796_v34 = vld [vmem:[#allocation2 + $0x270] sm:$0xff] }
 0x1bd   : > { %916 = vst [vmem:[#allocation2 + $0x200] sm:$0xf] %v900_v29  ;;  %1124 = vrot.lane.b32.xlu1 %v1098_v13, %s2610_s5  ;;  %1122 = vrot.lane.b32.xlu0 %v3365_v25, %s2610_s5 }
 0x1be   : > { %1879 = vmatpush1.msra.mxu0 %v1796_v34 }
 0x1bf   : > { %v943_v35 = vpop.permute.xlu1 %942  ;;  %v941_v36 = vpop.permute.xlu0 %940 }
 0x1c0   : > { %v956_v2 = vsel %vm3656_vm7, %v939_v30, %v941_v36  ;;  %v957_v23 = vsel %vm3656_vm7, %v941_v36, %v943_v35  ;;  %v2470_v36 = vld [vmem:[%s2728_s29 + $0x20] ss:$0 sps:$4 sm:$0xff]  }
 0x1c1   : > { %972 = vst [vmem:[#allocation2 + $0x228] sm:$0xf0] %v956_v2  ;;  %973 = vst [vmem:[#allocation2 + $0x178] sm:$0xf0] %v957_v23  ;;  %1178 = vrot.lane.b32.xlu1 %v3381_v19, %s2611_s6  ;;  %1176 = vrot.lane.b32.xlu0 %v2478_v40, %s2611_s6 }
 0x1c3   : > { %v879_v8 = vpop.permute.xlu1 %878  ;;  %v3390_v42 = vpop.permute.xlu0 %944 }
 0x1c4   : > { %v897_v43 = vsel %vm3655_vm6, %v879_v8, %v881_v12  ;;  %v958_v44 = vsel %vm3656_vm7, %v943_v35, %v3390_v42  ;;  %vm781_vm6 = vcmask 220160  }
 0x1c5   : > { %913 = vst [vmem:[#allocation2 + $0x2b8] sm:$0xf] %v897_v43  ;;  %974 = vst [vmem:[#allocation2 + $0x200] sm:$0xf0] %v958_v44  ;;  %1182 = vrot.lane.b32.xlu1 %v2468_v41, %s2611_s6  ;;  %1180 = vrot.lane.b32.xlu0 %v3359_v16, %s2611_s6 }
 0x1c7   : > { %v766_v47 = vpop.permute.xlu1 %765  ;;  %v937_v48 = vpop.permute.xlu0 %936 }
 0x1c8   : > { %v955_v61 = vsel %vm3656_vm7, %v937_v48, %v939_v30  ;;  %v1789_v28 = vld [vmem:[#allocation2 + $0x228] sm:$0xff]  ;;  %v1790_v56 = vld [vmem:[#allocation2 + $0x178] sm:$0xff]  ;;  %vm839_vm7 = vcmask 211968  }
 0x1c9   : > { %971 = vst [vmem:[#allocation2 + $0x2b8] sm:$0xf0] %v955_v61  ;;  %1005 = vrot.lane.b32.xlu1 %v3359_v16, %s3662_s11  ;;  %1003 = vrot.lane.b32.xlu0 %v3397_v45, %s3662_s11 }
 0x1ca   : > { %1880 = vmatprep.subr.mxu0 %v1789_v28  ;;  %v1765_v28 = vld [vmem:[#allocation2 + $0x120] sm:$0xff] }
 0x1cb   : > { %v770_v9 = vpop.permute.xlu1 %769  ;;  %v768_v51 = vpop.permute.xlu0 %767 }
 0x1cc   : > { %v783_v53 = vsel %vm781_vm6, %v766_v47, %v768_v51  ;;  %v784_v54 = vsel %vm781_vm6, %v768_v51, %v770_v9  ;;  %v1791_v37 = vld [vmem:[#allocation2 + $0x200] sm:$0xff] }
 0x1cd   : > { %799 = vst [vmem:[#allocation2 + $0x2f0] sm:$0xf] %v783_v53  ;;  %800 = vst [vmem:[#allocation2 + $0x358] sm:$0xf] %v784_v54  ;;  %1009 = vrot.lane.b32.xlu1 %v983_v55, %s3662_s11  ;;  %1007 = vrot.lane.b32.xlu0 %v3365_v25, %s3662_s11  ;;  %v1757_v53 = vld [vmem:[#allocation2 + $0x330] sm:$0xff]  ;;  %s2512_s11 = sshll.u32 %s2619_s15, 4  ;;  %s2513_s11 = int_to_ptr.vmem [resolvable:$false] %s2512_s11 }
 0x1ce   : > { %1951 = vmatprep.subr.mxu1 %v1791_v37  ;;  %v1756_v37 = vld [vmem:[#allocation2 + $0x28] sm:$0xff] }
 0x1cf   : > { %1952 = vmatpush1.msra.mxu1 %v1790_v56  ;;  %v824_v58 = vpop.permute.xlu1 %823  ;;  %v3413_v59 = vpop.permute.xlu0 %771 }
 0x1d0   : > { %v785_v62 = vsel %vm781_vm6, %v770_v9, %v3413_v59  ;;  %v1788_v3 = vld [vmem:[#allocation2 + $0x2b8] sm:$0xff]  ;;  %v1764_v9 = vld [vmem:[#allocation2 + $0x350] sm:$0xff] }
 0x1d1   : > { %801 = vst [vmem:[#allocation2 + $0x1c0] sm:$0xf] %v785_v62  ;;  %1063 = vrot.lane.b32.xlu1 %v3381_v19, %s3663_s18  ;;  %1061 = vrot.lane.b32.xlu0 %v3103_v17, %s3663_s18  ;;  %v1767_v62 = vld [vmem:[#allocation2 + $0x260] sm:$0xff] }
 0x1d2   : > { %1881 = vmatpush1.msra.mxu0 %v1788_v3 }
 0x1d3   : > { %v828_v7 = vpop.permute.xlu1 %827  ;;  %v826_v4 = vpop.permute.xlu0 %825 }
 0x1d4   : > { %v841_v11 = vsel %vm839_vm7, %v824_v58, %v826_v4  ;;  %v842_v12 = vsel %vm839_vm7, %v826_v4, %v828_v7  ;;  %v1748_v4 = vld [vmem:[#allocation2 + $0x108] sm:$0xff] }
 0x1d5   : > { %857 = vst [vmem:[#allocation2 + $0x2f0] sm:$0xf0] %v841_v11  ;;  %858 = vst [vmem:[#allocation2 + $0x358] sm:$0xf0] %v842_v12  ;;  %1067 = vrot.lane.b32.xlu1 %v2469_v6, %s3663_s18  ;;  %1065 = vrot.lane.b32.xlu0 %v3359_v16, %s3663_s18  ;;  %v1759_v11 = vld [vmem:[#allocation2 + $0x198] sm:$0xff]  ;;  %v1741_v12 = vld [vmem:[#allocation2 + $0xd0] sm:$0xff] }
 0x1d6   : > { %s2514_s18 = scalar_lea.vmem %s2513_s11, 2048 }
 0x1d7   : > { %v764_v38 = vpop.permute.xlu1 %763  ;;  %v3427_v14 = vpop.permute.xlu0 %829 }
 0x1d8   : > { %v782_v15 = vsel %vm781_vm6, %v764_v38, %v766_v47  ;;  %v843_v50 = vsel %vm839_vm7, %v828_v7, %v3427_v14  ;;  %v1772_v47 = vld [vmem:[#allocation2 + $0xd8] sm:$0xff]  ;;  %v1749_v7 = vld [vmem:[#allocation2 + $0x110] sm:$0xff] }
 0x1d9   : > { %798 = vst [vmem:[#allocation2 + $0x1f8] sm:$0xf] %v782_v15  ;;  %859 = vst [vmem:[#allocation2 + $0x1c0] sm:$0xf0] %v843_v50  ;;  %890 = vrot.lane.b32.xlu1 %v3359_v16, %s2614_s9  ;;  %888 = vrot.lane.b32.xlu0 %v3397_v45, %s2614_s9  ;;  %v1758_v15 = vld [vmem:[#allocation2 + $0x2d0] sm:$0xff] }
 0x1db   : > { %v711_v21 = vpop.permute.xlu1 %710  ;;  %v822_v22 = vpop.permute.xlu0 %821 }
 0x1dc   : > { %v726_v24 = vsel %vm724_vm8, %v3091_v5, %v711_v21  ;;  %v840_v0 = vsel %vm839_vm7, %v822_v22, %v824_v58  ;;  %v1781_v13 = vld [vmem:[#allocation2 + $0x2f0] sm:$0xff]  ;;  %v1782_v2 = vld [vmem:[#allocation2 + $0x358] sm:$0xff]  ;;  %v753_v58 = vld [vmem:[%s2728_s29 + $0x20] sm:$0xf] }
 0x1dd   : > { %742 = vst [vmem:[#allocation2 + $0x298] sm:$0xf0] %v726_v24  ;;  %856 = vst [vmem:[#allocation2 + $0x1f8] sm:$0xf0] %v840_v0  ;;  %894 = vrot.lane.b32.xlu1 %v868_v20, %s2614_s9  ;;  %892 = vrot.lane.b32.xlu0 %v3365_v25, %s2614_s9  ;;  %v1751_v22 = vld [vmem:[#allocation2 + $0x318] sm:$0xff]  ;;  %v3477_v24 = vld [vmem:[%s3646_s1] sm:$0xff] }
 0x1de   : > { %1882 = vmatprep.subr.mxu0 %v1781_v13  ;;  %v1750_v0 = vld [vmem:[#allocation2 + $0x90] sm:$0xff] }
 0x1df   : > { %v3443_v30 = vpop.permute.xlu1 %714  ;;  %v713_v29 = vpop.permute.xlu0 %712 }
 0x1e0   : > { %v727_v34 = vsel %vm724_vm8, %v711_v21, %v713_v29  ;;  %v728_v5 = vsel %vm724_vm8, %v713_v29, %v3443_v30  ;;  %v1783_v35 = vld [vmem:[#allocation2 + $0x1c0] sm:$0xff]  ;;  %v1740_v21 = vld [vmem:[#allocation2 + $0x2b0] sm:$0xff] }
 0x1e1   : > { %743 = vst [vmem:[#allocation2 + $0xb8] sm:$0xf0] %v727_v34  ;;  %744 = vst [vmem:[#allocation2 + $0x170] sm:$0xf0] %v728_v5  ;;  %948 = vrot.lane.b32.xlu1 %v3381_v19, %s3664_s19  ;;  %946 = vrot.lane.b32.xlu0 %v3103_v17, %s3664_s19  ;;  %v2479_v34 = vld [vmem:[%s2728_s29 + $0x10] sm:$0xff]  ;;  %v1743_v5 = vld [vmem:[#allocation2 + $0x48] sm:$0xff] }
 0x1e2   : > { %1953 = vmatprep.subr.mxu1 %v1783_v35 }
 0x1e3   : > { %1954 = vmatpush1.msra.mxu1 %v1782_v2  ;;  %v1701_v23 = vpop.permute.xlu1 %1700  ;;  %v1699_v40 = vpop.permute.xlu0 %1698 }
 0x1e4   : > { %v1711_v41 = vsel %vm1706_vm9, %v3117_v18, %v1699_v40  ;;  %v1712_v8 = vsel %vm1706_vm9, %v1699_v40, %v1701_v23  ;;  %v1780_v43 = vld [vmem:[#allocation2 + $0x1f8] sm:$0xff]  ;;  %v1742_v40 = vld [vmem:[#allocation2 + $0x10] sm:$0xff] }
 0x1e5   : > { %v1773_v44 = vld [vmem:[#allocation2 + $0x298] sm:$0xff]  ;;  %1727 = vst [vmem:[#allocation2] sm:$0xf] %v1711_v41  ;;  %1728 = vst [vmem:[#allocation2 + $0x2a0] sm:$0xf] %v1712_v8  ;;  %952 = vrot.lane.b32.xlu1 %v2470_v36, %s3664_s19  ;;  %950 = vrot.lane.b32.xlu0 %v3359_v16, %s3664_s19 }
 0x1e6   : > { %1883 = vmatpush1.msra.mxu0 %v1780_v43 }
 0x1e7   : > { %1884 = vmatprep.subr.mxu0 %v1773_v44  ;;  %v1705_v17 = vpop.permute.xlu1 %1704  ;;  %v1703_v48 = vpop.permute.xlu0 %1702 }
 0x1e8   : > { %1885 = vmatpush1.msra.mxu0 %v1772_v47  ;;  %v1713_v61 = vsel %vm1706_vm9, %v1701_v23, %v1703_v48  ;;  %v1714_v18 = vsel %vm1706_vm9, %v1703_v48, %v1705_v17  ;;  %v1775_v55 = vld [vmem:[#allocation2 + $0x170] sm:$0xff]  ;;  %v1774_v51 = vld [vmem:[#allocation2 + $0xb8] sm:$0xff]  ;;  %vm1858_vm9 = vcmask 916480   ;;  %v2473_v23 = vld [vmem:[%s2728_s29 + $0x20] ss:$0 sps:$4 sm:$0xff]  }
 0x1e9   : > { %1729 = vst [vmem:[#allocation2 + $0x1b0] sm:$0xf] %v1713_v61  ;;  %1730 = vst [vmem:[#allocation2 + $0x150] sm:$0xf] %v1714_v18  ;;  %1886 = vmatprep.subr.mxu0 %v1765_v28  ;;  %775 = vrot.lane.b32.xlu1 %v3359_v16, %s2616_s7  ;;  %v2474_v28 = vld [vmem:[%s2728_s29 + $0x20] ss:$0 sps:$4 sm:$0xff]  }
 0x1ea   : > { %773 = vrot.lane.b32.xlu0 %v3397_v45, %s2616_s7  ;;  %1887 = vmatpush1.msra.mxu0 %v1764_v9  ;;  %v1766_v45 = vld [vmem:[#allocation2 + $0x1a0] sm:$0xff] }
 0x1eb   : > { %1955 = vmatprep.subr.mxu1 %v1775_v55  ;;  %1888 = vmatprep.subr.mxu0 %v1757_v53  ;;  %v1586_v54 = vpop.permute.xlu1 %1585  ;;  %v1584_v56 = vpop.permute.xlu0 %1583 }
 0x1ec   : > { %1956 = vmatpush1.msra.mxu1 %v1774_v51  ;;  %1889 = vmatpush1.msra.mxu0 %v1756_v37  ;;  %v1596_v3 = vsel %vm1591_vm10, %v3148_v39, %v1584_v56  ;;  %v1597_v6 = vsel %vm1591_vm10, %v1584_v56, %v1586_v54  ;;  %v1848_v35 = vld [vmem:[#allocation2] sm:$0xff] }
 0x1ed   : > { %1957 = vmatprep.subr.mxu1 %v1767_v62  ;;  %1612 = vst [vmem:[#allocation2 + $0x88] sm:$0xf] %v1596_v3  ;;  %1613 = vst [vmem:[#allocation2 + $0x368] sm:$0xf] %v1597_v6  ;;  %1890 = vmatprep.subr.mxu0 %v1749_v7  ;;  %v1852_v7 = vld [vmem:[%s3647_s2] sm:$0xff] }
 0x1ee   : > { %1958 = vmatpush1.msra.mxu1 %v1766_v45  ;;  %779 = vrot.lane.b32.xlu1 %v753_v58, %s2616_s7 }
 0x1ef   : > { %777 = vrot.lane.b32.xlu0 %v3365_v25, %s2616_s7  ;;  %1891 = vmatpush1.msra.mxu0 %v1748_v4  ;;  %v1590_v38 = vpop.permute.xlu1 %1589  ;;  %v1588_v39 = vpop.permute.xlu0 %1587  ;;  %v1849_v25 = vld [vmem:[#allocation2 + $0x2a0] sm:$0xff]  ;;  %v2618_v4 = vmov 0   ;;  %s3602_s7 = scalar_lea.hbm %s3648_s3, %s2341_s24 }
 0x1f0   : > { %1959 = vmatprep.subr.mxu1 %v1759_v11  ;;  %1892 = vmatprep.subr.mxu0 %v1741_v12  ;;  %v1598_v50 = vsel %vm1591_vm10, %v1586_v54, %v1588_v39  ;;  %v1599_v20 = vsel %vm1591_vm10, %v1588_v39, %v1590_v38  ;;  %v1851_v41 = vld [vmem:[#allocation2 + $0x150] sm:$0xff]  ;;  %vm3665_vm10 = vcmask 146432  }
 0x1f1   : > { %1960 = vmatpush1.msra.mxu1 %v1758_v15  ;;  %1614 = vst [vmem:[#allocation2 + $0x180] sm:$0xf] %v1598_v50  ;;  %1615 = vst [vmem:[#allocation2 + $0x250] sm:$0xf] %v1599_v20  ;;  %1893 = vmatpush1.msra.mxu0 %v1740_v21  ;;  %v1850_v8 = vld [vmem:[#allocation2 + $0x1b0] sm:$0xff] }
 0x1f2   : > { %1961 = vmatprep.subr.mxu1 %v1751_v22  ;;  %2008 = vmatprep.subr.mxu0 %v1849_v25 }
 0x1f3   : > { %1962 = vmatpush1.msra.mxu1 %v1750_v0  ;;  %833 = vrot.lane.b32.xlu1 %v3381_v19, %s2617_s8  ;;  %v1644_v13 = vpop.permute.xlu1 %1643  ;;  %v1642_v29 = vpop.permute.xlu0 %1641 }
 0x1f4   : > { %831 = vrot.lane.b32.xlu0 %v2479_v34, %s2617_s8  ;;  %2332 = vmatmul.mubr.msk.f32.vlgmr.msra.gmra.mxu0 %vm1858_vm9, %v3477_v24  ;;  %v1654_v36 = vsel %vm1649_vm11, %v3161_v46, %v1642_v29  ;;  %v1655_v2 = vsel %vm1649_vm11, %v1642_v29, %v1644_v13 }
 0x1f5   : > { %1963 = vmatprep.subr.mxu1 %v1743_v5  ;;  %2009 = vmatpush1.msra.mxu0 %v1848_v35  ;;  %1670 = vst [vmem:[#allocation2 + $0x88] sm:$0xf0] %v1654_v36  ;;  %1671 = vst [vmem:[#allocation2 + $0x368] sm:$0xf0] %v1655_v2 }
 0x1f6   : > { %1964 = vmatpush1.msra.mxu1 %v1742_v40  ;;  %2068 = vmatprep.mubr.f32.mxu0 %v2599_v49 }
 0x1f7   : > { %2079 = vmatprep.subr.mxu1 %v1851_v41  ;;  %2333 = vmatmul.mubr.msk.f32.vlgmr.msra.gmra.mxu1 %vm1858_vm9, %v3477_v24  ;;  %v1648_v43 = vpop.permute.xlu1 %1647  ;;  %v1646_v46 = vpop.permute.xlu0 %1645 }
 0x1f8   : > { %2080 = vmatpush1.msra.mxu1 %v1850_v8  ;;  %837 = vrot.lane.b32.xlu1 %v2473_v23, %s2617_s8  ;;  %v1656_v44 = vsel %vm1649_vm11, %v1644_v13, %v1646_v46  ;;  %v1657_v17 = vsel %vm1649_vm11, %v1646_v46, %v1648_v43  ;;  %vm3666_vm11 = vmmov %vm3665_vm10 }
 0x1f9   : > { %835 = vrot.lane.b32.xlu0 %v3359_v16, %s2617_s8  ;;  %1672 = vst [vmem:[#allocation2 + $0x180] sm:$0xf0] %v1656_v44  ;;  %1673 = vst [vmem:[#allocation2 + $0x250] sm:$0xf0] %v1657_v17  ;;  %2139 = vmatprep.mubr.f32.mxu1 %v2599_v49  ;;  %s2179_s8 = scalar_lea.sflag [#allocation5], %s2724_s22 }
 0x1fa   : > { %2435 = vset.pattern.permute.xlu0 %v2618_v4 }
 0x1fb   : > { %v1471_v47 = vpop.permute.xlu1 %1470  ;;  %v1469_v48 = vpop.permute.xlu0 %1468 }
 0x1fc   : > { %718 = vrot.lane.b32.xlu1 %v3381_v19, %s2600_s10  ;;  %v1481_v61 = vsel %vm1476_vm12, %v3180_v57, %v1469_v48  ;;  %v1482_v18 = vsel %vm1476_vm12, %v1469_v48, %v1471_v47  ;;  %v1841_v55 = vld [vmem:[#allocation2 + $0x368] sm:$0xff] }
 0x1fd   : > { %v1840_v9 = vld [vmem:[#allocation2 + $0x88] sm:$0xff]  ;;  %716 = vrot.lane.b32.xlu0 %v2479_v34, %s2600_s10  ;;  %1497 = vst [vmem:[#allocation2 + $0x280] sm:$0xf] %v1481_v61  ;;  %1498 = vst [vmem:[#allocation2 + $0x300] sm:$0xf] %v1482_v18  ;;  %2010 = vmatprep.subr.mxu0 %v1841_v55 }
 0x1fe   : > { %2011 = vmatpush1.msra.mxu0 %v1840_v9 }
 0x1ff   : > { %v1475_v49 = vpop.permute.xlu1 %1474  ;;  %v1473_v51 = vpop.permute.xlu0 %1472 }
 0x200   : > { %722 = vrot.lane.b32.xlu1 %v2474_v28, %s2600_s10  ;;  %v1483_v19 = vsel %vm1476_vm12, %v1471_v47, %v1473_v51  ;;  %v1484_v53 = vsel %vm1476_vm12, %v1473_v51, %v1475_v49  ;;  %v1843_v57 = vld [vmem:[#allocation2 + $0x250] sm:$0xff]  ;;  %v1842_v54 = vld [vmem:[#allocation2 + $0x180] sm:$0xff]  ;;  %vm3667_vm12 = vmmov %vm3665_vm10 }
 0x201   : > { %720 = vrot.lane.b32.xlu0 %v3359_v16, %s2600_s10  ;;  %1499 = vst [vmem:[#allocation2 + $0x308] sm:$0xf] %v1483_v19  ;;  %1500 = vst [vmem:[#allocation2 + $0x290] sm:$0xf] %v1484_v53  ;;  %2081 = vmatprep.subr.mxu1 %v1843_v57  ;;  %s2286_s10 = sshll.u32 %s2724_s22, 6 }
 0x202   : > { %2082 = vmatpush1.msra.mxu1 %v1842_v54  ;;  %s3588_s30 = scalar_lea.vmem [#allocation6], %s2286_s10 }
 0x203   : > { %v1529_v37 = vpop.permute.xlu1 %1528  ;;  %v1527_v56 = vpop.permute.xlu0 %1526  ;;  %s2195_s4 = sshll.u32 %s3588_s30, 4  ;;  %s2196_s4 = int_to_ptr.vmem [resolvable:$true] %s2195_s4 }
 0x204   : > { %v1539_v58 = vsel %vm1534_vm13, %v3193_v10, %v1527_v56  ;;  %v1540_v62 = vsel %vm1534_vm13, %v1527_v56, %v1529_v37  ;;  %s2508_s9 = scalar_lea.vmem %s2196_s4, 1024  ;;  %p2515_p0 = scmp.lt.s32.totalorder %s2196_s4, %s2513_s11 }
 0x205   : > { %1555 = vst [vmem:[#allocation2 + $0x280] sm:$0xf0] %v1539_v58  ;;  %1556 = vst [vmem:[#allocation2 + $0x300] sm:$0xf0] %v1540_v62  ;;  %1855 = vperm.xlu0 %2435, %v1852_v7   ;;  %p2509_p8 = scmp.ne.s32.totalorder %s2196_s4, %s2508_s9  ;;  %p2516_p1 = scmp.lt.s32.totalorder %s2514_s18, %s2508_s9 }
 0x207   : > { %v1533_v3 = vpop.permute.xlu1 %1532  ;;  %v1531_v6 = vpop.permute.xlu0 %1530  ;;  %p2510_p11 = pnand %p2509_p8, %p2691_p9  ;;  %p2517_p2 = por %p2516_p1, %p2515_p0 }
 0x208   : > { %v1541_v16 = vsel %vm1534_vm13, %v1529_v37, %v1531_v6  ;;  %v1542_v45 = vsel %vm1534_vm13, %v1531_v6, %v1533_v3  ;;  %vm3668_vm13 = vmmov %vm3665_vm10 }
 0x209   : > { %1557 = vst [vmem:[#allocation2 + $0x308] sm:$0xf0] %v1541_v16  ;;  %1558 = vst [vmem:[#allocation2 + $0x290] sm:$0xf0] %v1542_v45  ;;  %p2511_p12 = pneg %p2510_p11 }
 0x20b   : > { %v1356_v10 = vpop.permute.xlu1 %1355  ;;  %v1354_v11 = vpop.permute.xlu0 %1353  ;;  %p2518_p3 = pnand %p2517_p2, %p2511_p12 }
 0x20c   : > { %v1366_v12 = vsel %vm1361_vm14, %v3213_v27, %v1354_v11  ;;  %v1367_v38 = vsel %vm1361_vm14, %v1354_v11, %v1356_v10  ;;  %v1833_v39 = vld [vmem:[#allocation2 + $0x300] sm:$0xff] }
 0x20d   : > { %v1832_v15 = vld [vmem:[#allocation2 + $0x280] sm:$0xff]  ;;  %1382 = vst [vmem:[#allocation2 + $0x188] sm:$0xf] %v1366_v12  ;;  %1383 = vst [vmem:[#allocation2 + $0x238] sm:$0xf] %v1367_v38  ;;  %2012 = vmatprep.subr.mxu0 %v1833_v39 }
 0x20e   : > { %2013 = vmatpush1.msra.mxu0 %v1832_v15 }
 0x20f   : > { %v1360_v50 = vpop.permute.xlu1 %1359  ;;  %v1358_v20 = vpop.permute.xlu0 %1357 }
 0x210   : > { %v1368_v21 = vsel %vm1361_vm14, %v1356_v10, %v1358_v20  ;;  %v1369_v22 = vsel %vm1361_vm14, %v1358_v20, %v1360_v50  ;;  %v1835_v25 = vld [vmem:[#allocation2 + $0x290] sm:$0xff]  ;;  %v1834_v0 = vld [vmem:[#allocation2 + $0x308] sm:$0xff]  ;;  %vm3669_vm14 = vcmask 138240  }
 0x211   : > { %1384 = vst [vmem:[#allocation2 + $0x2c8] sm:$0xf] %v1368_v21  ;;  %1385 = vst [vmem:[#allocation2 + $0x70] sm:$0xf] %v1369_v22  ;;  %2083 = vmatprep.subr.mxu1 %v1835_v25 }
 0x212   : > { %2084 = vmatpush1.msra.mxu1 %v1834_v0 }
 0x213   : > { %v1414_v27 = vpop.permute.xlu1 %1413  ;;  %v1412_v13 = vpop.permute.xlu0 %1411 }
 0x214   : > { %v1424_v29 = vsel %vm1419_vm15, %v3239_v1, %v1412_v13  ;;  %v1425_v34 = vsel %vm1419_vm15, %v1412_v13, %v1414_v27 }
 0x215   : > { %1440 = vst [vmem:[#allocation2 + $0x188] sm:$0xf0] %v1424_v29  ;;  %1441 = vst [vmem:[#allocation2 + $0x238] sm:$0xf0] %v1425_v34 }
 0x217   : > { %v1418_v5 = vpop.permute.xlu1 %1417  ;;  %v1416_v35 = vpop.permute.xlu0 %1415 }
 0x218   : > { %v1426_v36 = vsel %vm1419_vm15, %v1414_v27, %v1416_v35  ;;  %v1427_v2 = vsel %vm1419_vm15, %v1416_v35, %v1418_v5  ;;  %vm3670_vm15 = vmmov %vm3669_vm14 }
 0x219   : > { %1442 = vst [vmem:[#allocation2 + $0x2c8] sm:$0xf0] %v1426_v36  ;;  %1443 = vst [vmem:[#allocation2 + $0x70] sm:$0xf0] %v1427_v2 }
 0x21b   : > { %v1241_v23 = vpop.permute.xlu1 %1240  ;;  %v1239_v40 = vpop.permute.xlu0 %1238 }
 0x21c   : > { %v1251_v41 = vsel %vm1246_vm0, %v3262_v32, %v1239_v40  ;;  %v1252_v8 = vsel %vm1246_vm0, %v1239_v40, %v1241_v23  ;;  %v1825_v1 = vld [vmem:[#allocation2 + $0x238] sm:$0xff]  ;;  %v1824_v43 = vld [vmem:[#allocation2 + $0x188] sm:$0xff] }
 0x21d   : > { %1267 = vst [vmem:[#allocation2 + $0x80] sm:$0xf] %v1251_v41  ;;  %1268 = vst [vmem:[#allocation2 + $0x1f0] sm:$0xf] %v1252_v8  ;;  %2014 = vmatprep.subr.mxu0 %v1825_v1 }
 0x21e   : > { %2015 = vmatpush1.msra.mxu0 %v1824_v43 }
 0x21f   : > { %v1245_v46 = vpop.permute.xlu1 %1244  ;;  %v1243_v44 = vpop.permute.xlu0 %1242 }
 0x220   : > { %v1253_v17 = vsel %vm1246_vm0, %v1241_v23, %v1243_v44  ;;  %v1254_v47 = vsel %vm1246_vm0, %v1243_v44, %v1245_v46  ;;  %v1827_v48 = vld [vmem:[#allocation2 + $0x70] sm:$0xff]  ;;  %v1826_v61 = vld [vmem:[#allocation2 + $0x2c8] sm:$0xff]  ;;  %vm3671_vm0 = vmmov %vm3669_vm14 }
 0x221   : > { %1269 = vst [vmem:[#allocation2 + $0x160] sm:$0xf] %v1253_v17  ;;  %1270 = vst [vmem:[#allocation2 + $0x60] sm:$0xf] %v1254_v47  ;;  %2085 = vmatprep.subr.mxu1 %v1827_v48 }
 0x222   : > { %2086 = vmatpush1.msra.mxu1 %v1826_v61 }
 0x223   : > { %v1299_v32 = vpop.permute.xlu1 %1298  ;;  %v1297_v18 = vpop.permute.xlu0 %1296 }
 0x224   : > { %v1309_v28 = vsel %vm1304_vm1, %v3276_v63, %v1297_v18  ;;  %v1310_v55 = vsel %vm1304_vm1, %v1297_v18, %v1299_v32 }
 0x225   : > { %1325 = vst [vmem:[#allocation2 + $0x80] sm:$0xf0] %v1309_v28  ;;  %1326 = vst [vmem:[#allocation2 + $0x1f0] sm:$0xf0] %v1310_v55 }
 0x227   : > { %v1303_v9 = vpop.permute.xlu1 %1302  ;;  %v1301_v49 = vpop.permute.xlu0 %1300 }
 0x228   : > { %v1311_v51 = vsel %vm1304_vm1, %v1299_v32, %v1301_v49  ;;  %v1312_v19 = vsel %vm1304_vm1, %v1301_v49, %v1303_v9  ;;  %vm3672_vm1 = vmmov %vm3671_vm0 }
 0x229   : > { %1327 = vst [vmem:[#allocation2 + $0x160] sm:$0xf0] %v1311_v51  ;;  %1328 = vst [vmem:[#allocation2 + $0x60] sm:$0xf0] %v1312_v19 }
 0x22b   : > { %v1121_v53 = vpop.permute.xlu1 %1120  ;;  %v1119_v57 = vpop.permute.xlu0 %1118 }
 0x22c   : > { %v1131_v54 = vsel %vm1126_vm2, %v3297_v26, %v1119_v57  ;;  %v1132_v37 = vsel %vm1126_vm2, %v1119_v57, %v1121_v53  ;;  %v1817_v63 = vld [vmem:[#allocation2 + $0x1f0] sm:$0xff]  ;;  %v1816_v56 = vld [vmem:[#allocation2 + $0x80] sm:$0xff] }
 0x22d   : > { %1147 = vst [vmem:[#allocation2 + $0x338] sm:$0xf] %v1131_v54  ;;  %1148 = vst [vmem:[#allocation2 + $0x230] sm:$0xf] %v1132_v37  ;;  %2016 = vmatprep.subr.mxu0 %v1817_v63 }
 0x22e   : > { %2017 = vmatpush1.msra.mxu0 %v1816_v56 }
 0x22f   : > { %v1125_v58 = vpop.permute.xlu1 %1124  ;;  %v1123_v62 = vpop.permute.xlu0 %1122 }
 0x230   : > { %v1133_v3 = vsel %vm1126_vm2, %v1121_v53, %v1123_v62  ;;  %v1134_v6 = vsel %vm1126_vm2, %v1123_v62, %v1125_v58  ;;  %v1819_v7 = vld [vmem:[#allocation2 + $0x60] sm:$0xff] }
 0x231   : > { %v1818_v16 = vld [vmem:[#allocation2 + $0x160] sm:$0xff]  ;;  %1149 = vst [vmem:[#allocation2 + $0xc0] sm:$0xf] %v1133_v3  ;;  %1150 = vst [vmem:[#allocation2 + $0x128] sm:$0xf] %v1134_v6  ;;  %2087 = vmatprep.subr.mxu1 %v1819_v7 }
 0x232   : > { %2088 = vmatpush1.msra.mxu1 %v1818_v16 }
 0x233   : > { %v1179_v26 = vpop.permute.xlu1 %1178  ;;  %v1177_v45 = vpop.permute.xlu0 %1176 }
 0x234   : > { %v1189_v4 = vsel %vm1184_vm3, %v3311_v60, %v1177_v45  ;;  %v1190_v10 = vsel %vm1184_vm3, %v1177_v45, %v1179_v26 }
 0x235   : > { %1205 = vst [vmem:[#allocation2 + $0x338] sm:$0xf0] %v1189_v4  ;;  %1206 = vst [vmem:[#allocation2 + $0x230] sm:$0xf0] %v1190_v10 }
 0x237   : > { %v1183_v11 = vpop.permute.xlu1 %1182  ;;  %v1181_v12 = vpop.permute.xlu0 %1180 }
 0x238   : > { %v1191_v38 = vsel %vm1184_vm3, %v1179_v26, %v1181_v12  ;;  %v1192_v39 = vsel %vm1184_vm3, %v1181_v12, %v1183_v11 }
 0x239   : > { %1207 = vst [vmem:[#allocation2 + $0xc0] sm:$0xf0] %v1191_v38  ;;  %1208 = vst [vmem:[#allocation2 + $0x128] sm:$0xf0] %v1192_v39 }
 0x23b   : > { %v1006_v15 = vpop.permute.xlu1 %1005  ;;  %v1004_v50 = vpop.permute.xlu0 %1003 }
 0x23c   : > { %v1016_v20 = vsel %vm1011_vm4, %v3330_v52, %v1004_v50  ;;  %v1017_v21 = vsel %vm1011_vm4, %v1004_v50, %v1006_v15  ;;  %v1809_v60 = vld [vmem:[#allocation2 + $0x230] sm:$0xff]  ;;  %v1808_v22 = vld [vmem:[#allocation2 + $0x338] sm:$0xff] }
 0x23d   : > { %1032 = vst [vmem:[#allocation2 + $0x138] sm:$0xf] %v1016_v20  ;;  %1033 = vst [vmem:[#allocation2 + $0x2c0] sm:$0xf] %v1017_v21  ;;  %2018 = vmatprep.subr.mxu0 %v1809_v60 }
 0x23e   : > { %2019 = vmatpush1.msra.mxu0 %v1808_v22 }
 0x23f   : > { %v1010_v25 = vpop.permute.xlu1 %1009  ;;  %v1008_v0 = vpop.permute.xlu0 %1007 }
 0x240   : > { %v1018_v27 = vsel %vm1011_vm4, %v1006_v15, %v1008_v0  ;;  %v1019_v13 = vsel %vm1011_vm4, %v1008_v0, %v1010_v25  ;;  %v1811_v29 = vld [vmem:[#allocation2 + $0x128] sm:$0xff]  ;;  %v1810_v34 = vld [vmem:[#allocation2 + $0xc0] sm:$0xff] }
 0x241   : > { %1034 = vst [vmem:[#allocation2 + $0xe8] sm:$0xf] %v1018_v27  ;;  %1035 = vst [vmem:[#allocation2 + $0x1d8] sm:$0xf] %v1019_v13  ;;  %2089 = vmatprep.subr.mxu1 %v1811_v29 }
 0x242   : > { %2090 = vmatpush1.msra.mxu1 %v1810_v34  ;;  %v1769_v34 = vld [vmem:[#allocation2 + $0x130] sm:$0xff] }
 0x243   : > { %v1064_v52 = vpop.permute.xlu1 %1063  ;;  %v1062_v5 = vpop.permute.xlu0 %1061 }
 0x244   : > { %v1074_v35 = vsel %vm1069_vm5, %v3344_v33, %v1062_v5  ;;  %v1075_v36 = vsel %vm1069_vm5, %v1062_v5, %v1064_v52  ;;  %v1761_v5 = vld [vmem:[#allocation2 + $0x158] sm:$0xff] }
 0x245   : > { %1090 = vst [vmem:[#allocation2 + $0x138] sm:$0xf0] %v1074_v35  ;;  %1091 = vst [vmem:[#allocation2 + $0x2c0] sm:$0xf0] %v1075_v36 }
 0x247   : > { %v1068_v2 = vpop.permute.xlu1 %1067  ;;  %v1066_v23 = vpop.permute.xlu0 %1065 }
 0x248   : > { %v1076_v40 = vsel %vm1069_vm5, %v1064_v52, %v1066_v23  ;;  %v1077_v41 = vsel %vm1069_vm5, %v1066_v23, %v1068_v2  ;;  %v1768_v52 = vld [vmem:[#allocation2 + $0xe0] sm:$0xff]  ;;  %v1760_v2 = vld [vmem:[#allocation2 + $0x1a8] sm:$0xff] }
 0x249   : > { %1092 = vst [vmem:[#allocation2 + $0xe8] sm:$0xf0] %v1076_v40  ;;  %1093 = vst [vmem:[#allocation2 + $0x1d8] sm:$0xf0] %v1077_v41  ;;  %v1753_v23 = vld [vmem:[#allocation2 + $0x100] sm:$0xff]  ;;  %v1771_v40 = vld [vmem:[#allocation2 + $0x38] sm:$0xff] }
 0x24a   : > { %v1752_v41 = vld [vmem:[#allocation2 + $0x148] sm:$0xff] }
 0x24b   : > { %v891_v8 = vpop.permute.xlu1 %890  ;;  %v889_v1 = vpop.permute.xlu0 %888 }
 0x24c   : > { %v901_v43 = vsel %vm3665_vm10, %v3372_v31, %v889_v1  ;;  %v902_v46 = vsel %vm3666_vm11, %v889_v1, %v891_v8  ;;  %v1801_v33 = vld [vmem:[#allocation2 + $0x2c0] sm:$0xff]  ;;  %v1800_v44 = vld [vmem:[#allocation2 + $0x138] sm:$0xff]  ;;  %v1745_v1 = vld [vmem:[#allocation2 + $0x328] sm:$0xff] }
 0x24d   : > { %917 = vst [vmem:[#allocation2 + $0x2e8] sm:$0xf] %v901_v43  ;;  %918 = vst [vmem:[#allocation2 + $0x208] sm:$0xf] %v902_v46  ;;  %2020 = vmatprep.subr.mxu0 %v1801_v33  ;;  %v1763_v43 = vld [vmem:[#allocation2 + $0x278] sm:$0xff]  ;;  %v1744_v46 = vld [vmem:[#allocation2 + $0x360] sm:$0xff] }
 0x24e   : > { %2021 = vmatpush1.msra.mxu0 %v1800_v44  ;;  %v1762_v33 = vld [vmem:[#allocation2 + $0x2e0] sm:$0xff]  ;;  %v1755_v44 = vld [vmem:[#allocation2 + $0x2d8] sm:$0xff] }
 0x24f   : > { %v895_v17 = vpop.permute.xlu1 %894  ;;  %v893_v47 = vpop.permute.xlu0 %892 }
 0x250   : > { %v903_v48 = vsel %vm3667_vm12, %v891_v8, %v893_v47  ;;  %v904_v61 = vsel %vm3668_vm13, %v893_v47, %v895_v17  ;;  %v1803_v32 = vld [vmem:[#allocation2 + $0x1d8] sm:$0xff]  ;;  %v1802_v18 = vld [vmem:[#allocation2 + $0xe8] sm:$0xff] }
 0x251   : > { %919 = vst [vmem:[#allocation2 + $0x2f8] sm:$0xf] %v903_v48  ;;  %920 = vst [vmem:[#allocation2 + $0x268] sm:$0xf] %v904_v61  ;;  %2091 = vmatprep.subr.mxu1 %v1803_v32  ;;  %v1770_v8 = vld [vmem:[#allocation2 + $0x1e8] sm:$0xff]  ;;  %v1754_v17 = vld [vmem:[#allocation2 + $0x58] sm:$0xff] }
 0x252   : > { %2092 = vmatpush1.msra.mxu1 %v1802_v18  ;;  %v1747_v47 = vld [vmem:[#allocation2 + $0x378] sm:$0xff]  ;;  %v1746_v48 = vld [vmem:[#allocation2 + $0x40] sm:$0xff] }
 0x253   : > { %v949_v31 = vpop.permute.xlu1 %948  ;;  %v947_v28 = vpop.permute.xlu0 %946 }
 0x254   : > { %v959_v55 = vsel %vm3669_vm14, %v3390_v42, %v947_v28  ;;  %v960_v9 = vsel %vm3670_vm15, %v947_v28, %v949_v31 }
 0x255   : > { %975 = vst [vmem:[#allocation2 + $0x2e8] sm:$0xf0] %v959_v55  ;;  %976 = vst [vmem:[#allocation2 + $0x208] sm:$0xf0] %v960_v9 }
 0x257   : > { %v953_v49 = vpop.permute.xlu1 %952  ;;  %v951_v51 = vpop.permute.xlu0 %950 }
 0x258   : > { %v961_v19 = vsel %vm3671_vm0, %v949_v31, %v951_v51  ;;  %v962_v53 = vsel %vm3672_vm1, %v951_v51, %v953_v49 }
 0x259   : > { %977 = vst [vmem:[#allocation2 + $0x2f8] sm:$0xf0] %v961_v19  ;;  %978 = vst [vmem:[#allocation2 + $0x268] sm:$0xf0] %v962_v53 }
 0x25b   : > { %v776_v57 = vpop.permute.xlu1 %775 }
 0x25c   : > { %v774_v54 = vpop.permute.xlu0 %773  ;;  %v1793_v37 = vld [vmem:[#allocation2 + $0x208] sm:$0xff] }
 0x25d   : > { %v1792_v63 = vld [vmem:[#allocation2 + $0x2e8] sm:$0xff]  ;;  %v786_v56 = vsel %vm781_vm6, %v3413_v59, %v774_v54  ;;  %v787_v42 = vsel %vm781_vm6, %v774_v54, %v776_v57  ;;  %2022 = vmatprep.subr.mxu0 %v1793_v37 }
 0x25e   : > { %802 = vst [vmem:[#allocation2 + $0x248] sm:$0xf] %v786_v56  ;;  %803 = vst [vmem:[#allocation2 + $0x340] sm:$0xf] %v787_v42  ;;  %2023 = vmatpush1.msra.mxu0 %v1792_v63 }
 0x260   : > { %v780_v58 = vpop.permute.xlu1 %779  ;;  %v1795_v62 = vld [vmem:[#allocation2 + $0x268] sm:$0xff]  ;;  %v1794_v3 = vld [vmem:[#allocation2 + $0x2f8] sm:$0xff] }
 0x261   : > { %v778_v6 = vpop.permute.xlu0 %777  ;;  %2093 = vmatprep.subr.mxu1 %v1795_v62 }
 0x262   : > { %v788_v7 = vsel %vm781_vm6, %v776_v57, %v778_v6  ;;  %v789_v16 = vsel %vm781_vm6, %v778_v6, %v780_v58  ;;  %2094 = vmatpush1.msra.mxu1 %v1794_v3 }
 0x263   : > { %804 = vst [vmem:[#allocation2 + $0x2a8] sm:$0xf] %v788_v7  ;;  %805 = vst [vmem:[#allocation2 + $0x310] sm:$0xf] %v789_v16 }
 0x265   : > { %v834_v26 = vpop.permute.xlu1 %833 }
 0x266   : > { %v832_v59 = vpop.permute.xlu0 %831 }
 0x267   : > { %v844_v45 = vsel %vm839_vm7, %v3427_v14, %v832_v59  ;;  %v845_v4 = vsel %vm839_vm7, %v832_v59, %v834_v26 }
 0x268   : > { %860 = vst [vmem:[#allocation2 + $0x248] sm:$0xf0] %v844_v45  ;;  %861 = vst [vmem:[#allocation2 + $0x340] sm:$0xf0] %v845_v4 }
 0x26a   : > { %v838_v10 = vpop.permute.xlu1 %837 }
 0x26b   : > { %v836_v11 = vpop.permute.xlu0 %835 }
 0x26c   : > { %v846_v12 = vsel %vm839_vm7, %v834_v26, %v836_v11  ;;  %v847_v38 = vsel %vm839_vm7, %v836_v11, %v838_v10 }
 0x26d   : > { %862 = vst [vmem:[#allocation2 + $0x2a8] sm:$0xf0] %v846_v12  ;;  %863 = vst [vmem:[#allocation2 + $0x310] sm:$0xf0] %v847_v38 }
 0x26e   : > { %v719_v39 = vpop.permute.xlu1 %718 }
 0x26f   : > { %v717_v15 = vpop.permute.xlu0 %716  ;;  %v1785_v50 = vld [vmem:[#allocation2 + $0x340] sm:$0xff]  ;;  %v1784_v20 = vld [vmem:[#allocation2 + $0x248] sm:$0xff] }
 0x270   : > { %v729_v21 = vsel %vm724_vm8, %v3443_v30, %v717_v15  ;;  %v730_v14 = vsel %vm724_vm8, %v717_v15, %v719_v39  ;;  %2024 = vmatprep.subr.mxu0 %v1785_v50 }
 0x271   : > { %745 = vst [vmem:[#allocation2 + $0x98] sm:$0xf0] %v729_v21  ;;  %746 = vst [vmem:[#allocation2 + $0xa0] sm:$0xf0] %v730_v14  ;;  %2025 = vmatpush1.msra.mxu0 %v1784_v20 }
 0x272   : > { %v723_v60 = vpop.permute.xlu1 %722 }
 0x273   : > { %v721_v22 = vpop.permute.xlu0 %720 }
 0x274   : > { %v731_v25 = vsel %vm724_vm8, %v719_v39, %v721_v22  ;;  %v732_v0 = vsel %vm724_vm8, %v721_v22, %v723_v60  ;;  %v1787_v27 = vld [vmem:[#allocation2 + $0x310] sm:$0xff]  ;;  %v1786_v13 = vld [vmem:[#allocation2 + $0x2a8] sm:$0xff] }
 0x275   : > { %747 = vst [vmem:[#allocation2 + $0x320] sm:$0xf0] %v731_v25  ;;  %748 = vst [vmem:[#allocation2 + $0xf0] sm:$0xf0] %v732_v0  ;;  %2095 = vmatprep.subr.mxu1 %v1787_v27 }
 0x276   : > { %2096 = vmatpush1.msra.mxu1 %v1786_v13 }
 0x278   : > { %v1777_v29 = vld [vmem:[#allocation2 + $0xa0] sm:$0xff]  ;;  %v1776_v30 = vld [vmem:[#allocation2 + $0x98] sm:$0xff] }
 0x279   : > { %2026 = vmatprep.subr.mxu0 %v1777_v29 }
 0x27a   : > { %2027 = vmatpush1.msra.mxu0 %v1776_v30 }
 0x27b   : > { %2028 = vmatprep.subr.mxu0 %v1769_v34 }
 0x27c   : > { %2029 = vmatpush1.msra.mxu0 %v1768_v52  ;;  %v1779_v35 = vld [vmem:[#allocation2 + $0xf0] sm:$0xff]  ;;  %v1778_v36 = vld [vmem:[#allocation2 + $0x320] sm:$0xff] }
 0x27d   : > { %2030 = vmatprep.subr.mxu0 %v1761_v5  ;;  %2097 = vmatprep.subr.mxu1 %v1779_v35 }
 0x27e   : > { %2031 = vmatpush1.msra.mxu0 %v1760_v2  ;;  %2098 = vmatpush1.msra.mxu1 %v1778_v36 }
 0x27f   : > { %2032 = vmatprep.subr.mxu0 %v1753_v23  ;;  %2099 = vmatprep.subr.mxu1 %v1771_v40 }
 0x280   : > { %2033 = vmatpush1.msra.mxu0 %v1752_v41  ;;  %2100 = vmatpush1.msra.mxu1 %v1770_v8  ;;  %v1856_v61 = vpop.permute.xlu0 %1855 }
 0x281   : > { %2034 = vmatprep.subr.mxu0 %v1745_v1  ;;  %2101 = vmatprep.subr.mxu1 %v1763_v43 }
 0x282   : > { %2035 = vmatpush1.msra.mxu0 %v1744_v46  ;;  %2102 = vmatpush1.msra.mxu1 %v1762_v33 }
 0x283   : > { %2334 = vmatmul.mubr.msk.f32.vlgmr.msra.gmra.mxu0 %vm1858_vm9, %v3477_v24  ;;  %2103 = vmatprep.subr.mxu1 %v1755_v44 }
 0x284   : > { %2104 = vmatpush1.msra.mxu1 %v1754_v17 }
 0x285   : > { %2105 = vmatprep.subr.mxu1 %v1747_v47 }
 0x286   : > { %2106 = vmatpush1.msra.mxu1 %v1746_v48 }
 0x287   : > { %2335 = vmatmul.mubr.msk.f32.vlgmr.msra.gmra.mxu1 %vm1858_vm9, %v3477_v24 }
 0x2b4   : > { %v1928_v32 = vpop.f32.mrf.mxu0 }
 0x2b5   : > { %v1929_v18 = vadd.f32 %v1928_v32, %v1856_v61 }
 0x2b6   : > { %v1930_v31 = vpop.f32.mrf.mxu0 }
 0x2b7   : > { %v1999_v28 = vpop.f32.mrf.mxu1  ;;  %vm2146_vm8 = vcmp.ge.f32.partialorder %v1929_v18, 0.0  ;;  %v2154_v55 = vmul.f32 0.01, %v1929_v18  ;;  %v1931_v9 = vadd.f32 %v1930_v31, %v1856_v61 }
 0x2b8   : > { %v2000_v49 = vadd.f32 %v1999_v28, %v1856_v61 }
 0x2b9   : > { %v2162_v51 = vsel %vm2146_vm8, %v1929_v18, %v2154_v55  ;;  %vm2147_vm2 = vcmp.ge.f32.partialorder %v1931_v9, 0.0  ;;  %v2155_v19 = vmul.f32 0.01, %v1931_v9  ;;  %v2001_v53 = vpop.f32.mrf.mxu1 }
 0x2ba   : > { %vm2148_vm3 = vcmp.ge.f32.partialorder %v2000_v49, 0.0  ;;  %v2156_v57 = vmul.f32 0.01, %v2000_v49  ;;  %2170 = vst [vmem:[%s3588_s30] sm:$0xff] %v2162_v51  ;;  %v2002_v24 = vadd.f32 %v2001_v53, %v1856_v61 }
 0x2bb   : > { %v2163_v54 = vsel %vm2147_vm2, %v1931_v9, %v2155_v19 }
 0x2bc   : > { %v2164_v37 = vsel %vm2148_vm3, %v2000_v49, %v2156_v57  ;;  %2171 = vst [vmem:[%s3588_s30 + $0x8] sm:$0xff] %v2163_v54  ;;  %vm2149_vm4 = vcmp.ge.f32.partialorder %v2002_v24, 0.0  ;;  %v2157_v63 = vmul.f32 0.01, %v2002_v24 }
 0x2bd   : > { %2172 = vst [vmem:[%s3588_s30 + $0x10] sm:$0xff] %v2164_v37 }
 0x2be   : > { %v2165_v56 = vsel %vm2149_vm4, %v2002_v24, %v2157_v63 }
 0x2bf   : > { %2173 = vst [vmem:[%s3588_s30 + $0x18] sm:$0xff] %v2165_v56 }
 0x343   : > { %v2070_v42 = vpop.f32.mrf.mxu0 }
 0x344   : > { %v2071_v58 = vadd.f32 %v2070_v42, %v1856_v61 }
 0x345   : > { %v2072_v62 = vpop.f32.mrf.mxu0 }
 0x346   : > { %vm2150_vm5 = vcmp.ge.f32.partialorder %v2071_v58, 0.0  ;;  %v2158_v3 = vmul.f32 0.01, %v2071_v58  ;;  %v2073_v6 = vadd.f32 %v2072_v62, %v1856_v61 }
 0x347   : > { %v2141_v7 = vpop.f32.mrf.mxu1 }
 0x348   : > { %v2166_v16 = vsel %vm2150_vm5, %v2071_v58, %v2158_v3  ;;  %vm2151_vm6 = vcmp.ge.f32.partialorder %v2073_v6, 0.0  ;;  %v2159_v26 = vmul.f32 0.01, %v2073_v6  ;;  %v2142_v59 = vadd.f32 %v2141_v7, %v1856_v61 }
 0x349   : > { %2174 = vst [vmem:[%s3588_s30 + $0x20] sm:$0xff] %v2166_v16  ;;  %v2143_v45 = vpop.f32.mrf.mxu1 }
 0x34a   : > { %v2167_v4 = vsel %vm2151_vm6, %v2073_v6, %v2159_v26  ;;  %vm2152_vm7 = vcmp.ge.f32.partialorder %v2142_v59, 0.0  ;;  %v2160_v10 = vmul.f32 0.01, %v2142_v59  ;;  %v2144_v11 = vadd.f32 %v2143_v45, %v1856_v61 }
 0x34b   : > { %2175 = vst [vmem:[%s3588_s30 + $0x28] sm:$0xff] %v2167_v4 }
 0x34c   : > { %v2168_v12 = vsel %vm2152_vm7, %v2142_v59, %v2160_v10  ;;  %vm2153_vm9 = vcmp.ge.f32.partialorder %v2144_v11, 0.0  ;;  %v2161_v38 = vmul.f32 0.01, %v2144_v11 }
 0x34d   : > { %2176 = vst [vmem:[%s3588_s30 + $0x30] sm:$0xff] %v2168_v12 }
 0x34e   : > { %v2169_v39 = vsel %vm2153_vm9, %v2144_v11, %v2161_v38 }
 0x34f   : > { %2177 = vst [vmem:[%s3588_s30 + $0x38] sm:$0xff] %v2169_v39 }
 0x350   : > { %2521 = shalt.err (!%p2518_p3)
}
 0x351   : > { %s2522_s19 = scalar_lea.hbm %s3602_s7, 1024  ;;  %s2526_s23 = scalar_lea.hbm %s3648_s3, 2048 }
 0x352   : > { %p2523_p5 = scmp.ne.s32.totalorder %s3602_s7, %s2522_s19  ;;  %p2527_p7 = scmp.lt.s32.totalorder %s3602_s7, %s3648_s3 }
 0x353   : > { %p2528_p10 = scmp.lt.s32.totalorder %s2526_s23, %s2522_s19 }
 0x354   : > { %p2524_p6 = pnand %p2523_p5, %p2691_p9 }
 0x355   : > { %p2529_p13 = por %p2528_p10, %p2527_p7 }
 0x356   : > { %p2525_p4 = pneg %p2524_p6 }
 0x358   : > { %p2530_p8 = pnand %p2529_p13, %p2525_p4 }
 0x35a   : > { %2533 = shalt.err (!%p2530_p8)
}
 0x35b   : > { %2347 = dma.vmem_to_hbm [thread:$0]  (%p2691_p9), %s2196_s4, 1024, %s3602_s7, %s2179_s8  }
 0x35c PF: > { %s2207_s10 = sand.u32 1, %s2568_s12   ;;  %p3673_p11 = scmp.ne.s32.totalorder %s3660_s27, 0 }
 0x35d   : > { %p3674_p12 = scmp.ge.s32.totalorder %s2588_s17, 2  ;;  %s2208_s30 = scalar_lea.sflag [#allocation5], %s2207_s10 }
 0x35f   : > { %p2354_p0 = pnand %p3674_p12, %p3673_p11 }
 0x361   : > { %p2355_p1 = pneg %p2354_p0 }
 0x363   : > { %2563 = dma.done.wait (%p2355_p1), %s2208_s30, 1024  }
 0x364   : > { %2565 = vsyncadd (%p2355_p1), %s2208_s30, 4294966272  ;;  %s19_s17 = sadd.s32 1, %s2588_s17   ;;  %s3675_s12 = smov %s2572_s13 }
 0x365   : > { %p16_p2 = scmp.ge.s32.totalorder %s19_s17, 4   ;;  %s3676_s13 = smov %s2576_s14 }
 0x366   : > { %s3677_s14 = smov %s2696_s26  ;;  %s3678_s15 = smov %s2584_s16 }
 0x367   : > { %s3679_s16 = smov %s3681_s20  ;;  %18 = sbr.rel (!%p16_p2) target bundleno = 6 (0x6), region = 79 }
 0x36c   :  { %2213 = vsyncpa [#allocation4], 1 }
 0x36d   :  { %2215 = vsyncpa [#allocation4 + $0x1], 1 }
 0x36e   :  { %2216 = vsyncpa [#allocation5], 1 }
 0x36f   :  { %2218 = vsyncpa [#allocation5 + $0x1], 1 }

</bundles_post_ra>
